<compile_context>
chip_gen: v7x
topology: tpu7x:2x2x1
jax: 0.10.0
libtpu: 0.0.40
codegen_flags: <defaults>
</compile_context>

<pallas_src>
import jax
import jax.numpy as jnp
from jax.experimental import pallas as pl
from jax.experimental.pallas import tpu as pltpu

DIMS = [17, 512, 256, 128, 64, 32, 17]
F = DIMS[0]            # true feature width (17)
F_PAD = 128            # lane-dense feature width
NEG_SLOPE = 0.01
N_LAYERS = 6
N_BRANCHES = 4
DEFAULT_TM = 512       # row tile (sweep 256-1024; 512 fits easily in VMEM)


def _round_up(x, m):
    return (x + m - 1) // m * m


def _leaky_relu(h):
    return jnp.where(h > 0, h, NEG_SLOPE * h)


def _clst_kernel(x_ref,
                 w1, b1, w2, b2, w3, b3, w4, b4, w5, b5, w6, b6,
                 o_ref):
    """One branch's full 3x residual-MLP forward for a (tm, 128) row tile."""
    # Load weights/biases once; the 3 unrolled MLP passes reuse the values.
    ws = [w1[...], w2[...], w3[...], w4[...], w5[...], w6[...]]   # bf16
    bs = [b1[...], b2[...], b3[...], b4[...], b5[...], b6[...]]   # f32 (1, out)

    def mlp(h):
        for w, b in zip(ws, bs):
            h = jnp.dot(h.astype(jnp.bfloat16), w,
                        preferred_element_type=jnp.float32)
            h = _leaky_relu(h + b)
        return h

    x0 = x_ref[...]                 # (tm, F_PAD) f32, padded cols are zero
    h = mlp(x0) + x0
    h = mlp(h) + x0
    h = mlp(h) + x0
    o_ref[...] = h                  # lane-dense (tm, 128) store


def _pad_stack_params(params_list):
    """Stack the 4 branches' params and pad to lane-friendly shapes.

    params_list: 4 entries; each a list of 6 (W (in,out) f32, b (1,out) f32).
    Returns a flat list [W1s, b1s, ..., W6s, b6s] with
      W_li: (4, in_pad, out_pad) bf16   (zero-padded rows/cols)
      b_li: (4, 1, out_pad)      f32
    """
    flat = []
    for li in range(N_LAYERS):
        in_pad = F_PAD if li == 0 else DIMS[li]
        out_pad = F_PAD if li == N_LAYERS - 1 else DIMS[li + 1]
        ws, bs = [], []
        for p in params_list:
            w, b = p[li]
            ws.append(jnp.pad(w, ((0, in_pad - w.shape[0]),
                                  (0, out_pad - w.shape[1]))))
            bs.append(jnp.pad(b, ((0, 0), (0, out_pad - b.shape[1]))))
        flat.append(jnp.stack(ws).astype(jnp.bfloat16))
        flat.append(jnp.stack(bs).astype(jnp.float32))
    return flat


def _run_fused(x4, flat_params, *, tm):
    """x4: (4, M_pad, 128) f32 with M_pad a multiple of tm."""
    nb, m_pad, fp = x4.shape
    assert nb == N_BRANCHES and fp == F_PAD and m_pad % tm == 0
    grid = (nb, m_pad // tm)

    x_spec = pl.BlockSpec((pl.Squeezed(), tm, F_PAD), lambda b, i: (b, i, 0))
    in_specs = [x_spec]
    for arr in flat_params:
        in_specs.append(
            pl.BlockSpec((pl.Squeezed(),) + arr.shape[1:],
                         lambda b, i: (b, 0, 0)))
    out_spec = pl.BlockSpec((pl.Squeezed(), tm, F_PAD), lambda b, i: (b, i, 0))

    flops_per_row = 2 * sum(DIMS[i] * DIMS[i + 1] for i in range(N_LAYERS)) * 3
    weight_bytes = sum(int(a.size) * a.dtype.itemsize for a in flat_params)
    cost = pl.CostEstimate(
        flops=nb * m_pad * flops_per_row,
        transcendentals=0,
        bytes_accessed=2 * nb * m_pad * F_PAD * 4 + weight_bytes,
    )

    return pl.pallas_call(
        _clst_kernel,
        out_shape=jax.ShapeDtypeStruct((nb, m_pad, F_PAD), jnp.float32),
        grid_spec=pltpu.PrefetchScalarGridSpec(
            num_scalar_prefetch=0,
            grid=grid,
            in_specs=in_specs,
            out_specs=out_spec,
        ),
        compiler_params=pltpu.CompilerParams(
            dimension_semantics=("parallel", "parallel"),
        ),
        cost_estimate=cost,
    )(x4, *flat_params)


@jax.jit
def clst_forward(power_input, x_input, y_input, z_input,
                 params5, params6, params7, params8):
    inputs = (power_input, x_input, y_input, z_input)
    B, C, S = power_input.shape
    assert C == F
    for inp in inputs:
        assert inp.shape == (B, C, S)

    # (4, B, 17, S) -> (4, B, S, 17) -> (4, M, 17), then pad rows + lanes.
    x = jnp.stack(inputs, axis=0)
    x = jnp.transpose(x, (0, 1, 3, 2)).reshape(N_BRANCHES, B * S, C)

    M = B * S
    tm = min(DEFAULT_TM, _round_up(M, 8))
    M_pad = _round_up(M, tm)
    x = jnp.pad(x, ((0, 0), (0, M_pad - M), (0, F_PAD - C)))

    flat_params = _pad_stack_params([params5, params6, params7, params8])
    y = _run_fused(x, flat_params, tm=tm)

    y = y[:, :M, :C].reshape(N_BRANCHES, B, S, C)
    y = jnp.transpose(y, (0, 1, 3, 2))      # back to (4, B, 17, S)
    return y[0], y[1], y[2], y[3]


def _make_mlp_params(key):
    """Deterministic init of one 6-layer MLP: [(W (in,out), b (1,out))]."""
    params = []
    for li in range(N_LAYERS):
        fan_in, fan_out = DIMS[li], DIMS[li + 1]
        key, kw, kb = jax.random.split(key, 3)
        bound = 1.0 / jnp.sqrt(fan_in)
        w = jax.random.uniform(kw, (fan_in, fan_out), jnp.float32, -bound, bound)
        b = jax.random.uniform(kb, (1, fan_out), jnp.float32, -bound, bound)
        params.append((w, b))
    return params


def _reference_branch(x_bcs, params):
    """Pure-JAX reference of one branch (same bf16-operand mixed precision)."""
    x = jnp.transpose(x_bcs, (0, 2, 1))

    def mlp(h):
        for w, b in params:
            h = jnp.dot(h.astype(jnp.bfloat16), w.astype(jnp.bfloat16),
                        preferred_element_type=jnp.float32) + b[0]
            h = jnp.where(h > 0, h, NEG_SLOPE * h)
        return h

    h = mlp(x) + x
    h = mlp(h) + x
    h = mlp(h) + x
    return jnp.transpose(h, (0, 2, 1))


if __name__ == "__main__":
    key = jax.random.PRNGKey(0)
    k_in, k5, k6, k7, k8 = jax.random.split(key, 5)

    B, C, S = 2, 17, 8  # small demo shapes: batch=2, channels=17, seq=8
    kp, kx, ky, kz = jax.random.split(k_in, 4)
    power_input = jax.random.normal(kp, (B, C, S), jnp.float32)
    x_input = jax.random.normal(kx, (B, C, S), jnp.float32)
    y_input = jax.random.normal(ky, (B, C, S), jnp.float32)
    z_input = jax.random.normal(kz, (B, C, S), jnp.float32)

    params5 = _make_mlp_params(k5)
    params6 = _make_mlp_params(k6)
    params7 = _make_mlp_params(k7)
    params8 = _make_mlp_params(k8)

    outs = clst_forward(power_input, x_input, y_input, z_input,
                        params5, params6, params7, params8)
    outs = jax.block_until_ready(outs)

    # Sanity check against a pure-JAX mixed-precision reference.
    refs = (_reference_branch(power_input, params5),
            _reference_branch(x_input, params6),
            _reference_branch(y_input, params7),
            _reference_branch(z_input, params8))
    for o, r in zip(outs, refs):
        assert o.shape == (B, C, S)
        if not jnp.allclose(o, r, atol=2e-3, rtol=2e-3):
            raise AssertionError("Pallas output mismatch vs reference")

    print("KERNEL_OK")
</pallas_src>

<mosaic_0001>
module attributes {stable_mosaic.version = 11 : i64} {
  func.func @_clst_kernel(%arg0: i32, %arg1: i32, %arg2: memref<1x16x128xf32, #tpu.memory_space<vmem>>, %arg3: memref<1x128x512xbf16, #tpu.memory_space<vmem>>, %arg4: memref<1x1x512xf32, #tpu.memory_space<vmem>>, %arg5: memref<1x512x256xbf16, #tpu.memory_space<vmem>>, %arg6: memref<1x1x256xf32, #tpu.memory_space<vmem>>, %arg7: memref<1x256x128xbf16, #tpu.memory_space<vmem>>, %arg8: memref<1x1x128xf32, #tpu.memory_space<vmem>>, %arg9: memref<1x128x64xbf16, #tpu.memory_space<vmem>>, %arg10: memref<1x1x64xf32, #tpu.memory_space<vmem>>, %arg11: memref<1x64x32xbf16, #tpu.memory_space<vmem>>, %arg12: memref<1x1x32xf32, #tpu.memory_space<vmem>>, %arg13: memref<1x32x128xbf16, #tpu.memory_space<vmem>>, %arg14: memref<1x1x128xf32, #tpu.memory_space<vmem>>, %arg15: memref<1x16x128xf32, #tpu.memory_space<vmem>>) attributes {dimension_semantics = [#tpu.dimension_semantics<parallel>, #tpu.dimension_semantics<parallel>], iteration_bounds = array<i64: 4, 1>, scalar_prefetch = 0 : i64, scratch_operands = 0 : i64, tpu.core_type = #tpu.core_type<tc>, window_params = [{transform_indices = @transform_0, window_bounds = array<i64: 1, 16, 128>}, {transform_indices = @transform_1, window_bounds = array<i64: 1, 128, 512>}, {transform_indices = @transform_2, window_bounds = array<i64: 1, 1, 512>}, {transform_indices = @transform_3, window_bounds = array<i64: 1, 512, 256>}, {transform_indices = @transform_4, window_bounds = array<i64: 1, 1, 256>}, {transform_indices = @transform_5, window_bounds = array<i64: 1, 256, 128>}, {transform_indices = @transform_6, window_bounds = array<i64: 1, 1, 128>}, {transform_indices = @transform_7, window_bounds = array<i64: 1, 128, 64>}, {transform_indices = @transform_8, window_bounds = array<i64: 1, 1, 64>}, {transform_indices = @transform_9, window_bounds = array<i64: 1, 64, 32>}, {transform_indices = @transform_10, window_bounds = array<i64: 1, 1, 32>}, {transform_indices = @transform_11, window_bounds = array<i64: 1, 32, 128>}, {transform_indices = @transform_12, window_bounds = array<i64: 1, 1, 128>}, {transform_indices = @transform_13, window_bounds = array<i64: 1, 16, 128>}]} {
    %c0 = arith.constant 0 : index
    %c0_0 = arith.constant 0 : index
    %c0_1 = arith.constant 0 : index
    %0 = vector.load %arg3[%c0, %c0_0, %c0_1] : memref<1x128x512xbf16, #tpu.memory_space<vmem>>, vector<1x128x512xbf16>
    %1 = vector.shape_cast %0 : vector<1x128x512xbf16> to vector<128x512xbf16>
    %c0_2 = arith.constant 0 : index
    %c0_3 = arith.constant 0 : index
    %c0_4 = arith.constant 0 : index
    %2 = vector.load %arg5[%c0_2, %c0_3, %c0_4] : memref<1x512x256xbf16, #tpu.memory_space<vmem>>, vector<1x512x256xbf16>
    %3 = vector.shape_cast %2 : vector<1x512x256xbf16> to vector<512x256xbf16>
    %c0_5 = arith.constant 0 : index
    %c0_6 = arith.constant 0 : index
    %c0_7 = arith.constant 0 : index
    %4 = vector.load %arg7[%c0_5, %c0_6, %c0_7] : memref<1x256x128xbf16, #tpu.memory_space<vmem>>, vector<1x256x128xbf16>
    %5 = vector.shape_cast %4 : vector<1x256x128xbf16> to vector<256x128xbf16>
    %c0_8 = arith.constant 0 : index
    %c0_9 = arith.constant 0 : index
    %c0_10 = arith.constant 0 : index
    %6 = vector.load %arg9[%c0_8, %c0_9, %c0_10] : memref<1x128x64xbf16, #tpu.memory_space<vmem>>, vector<1x128x64xbf16>
    %7 = vector.shape_cast %6 : vector<1x128x64xbf16> to vector<128x64xbf16>
    %c0_11 = arith.constant 0 : index
    %c0_12 = arith.constant 0 : index
    %c0_13 = arith.constant 0 : index
    %8 = vector.load %arg11[%c0_11, %c0_12, %c0_13] : memref<1x64x32xbf16, #tpu.memory_space<vmem>>, vector<1x64x32xbf16>
    %9 = vector.shape_cast %8 : vector<1x64x32xbf16> to vector<64x32xbf16>
    %c0_14 = arith.constant 0 : index
    %c0_15 = arith.constant 0 : index
    %c0_16 = arith.constant 0 : index
    %10 = vector.load %arg13[%c0_14, %c0_15, %c0_16] : memref<1x32x128xbf16, #tpu.memory_space<vmem>>, vector<1x32x128xbf16>
    %11 = vector.shape_cast %10 : vector<1x32x128xbf16> to vector<32x128xbf16>
    %c0_17 = arith.constant 0 : index
    %c0_18 = arith.constant 0 : index
    %c0_19 = arith.constant 0 : index
    %12 = vector.load %arg4[%c0_17, %c0_18, %c0_19] : memref<1x1x512xf32, #tpu.memory_space<vmem>>, vector<1x1x512xf32>
    %13 = vector.shape_cast %12 : vector<1x1x512xf32> to vector<1x512xf32>
    %c0_20 = arith.constant 0 : index
    %c0_21 = arith.constant 0 : index
    %c0_22 = arith.constant 0 : index
    %14 = vector.load %arg6[%c0_20, %c0_21, %c0_22] : memref<1x1x256xf32, #tpu.memory_space<vmem>>, vector<1x1x256xf32>
    %15 = vector.shape_cast %14 : vector<1x1x256xf32> to vector<1x256xf32>
    %c0_23 = arith.constant 0 : index
    %c0_24 = arith.constant 0 : index
    %c0_25 = arith.constant 0 : index
    %16 = vector.load %arg8[%c0_23, %c0_24, %c0_25] : memref<1x1x128xf32, #tpu.memory_space<vmem>>, vector<1x1x128xf32>
    %17 = vector.shape_cast %16 : vector<1x1x128xf32> to vector<1x128xf32>
    %c0_26 = arith.constant 0 : index
    %c0_27 = arith.constant 0 : index
    %c0_28 = arith.constant 0 : index
    %18 = vector.load %arg10[%c0_26, %c0_27, %c0_28] : memref<1x1x64xf32, #tpu.memory_space<vmem>>, vector<1x1x64xf32>
    %19 = vector.shape_cast %18 : vector<1x1x64xf32> to vector<1x64xf32>
    %c0_29 = arith.constant 0 : index
    %c0_30 = arith.constant 0 : index
    %c0_31 = arith.constant 0 : index
    %20 = vector.load %arg12[%c0_29, %c0_30, %c0_31] : memref<1x1x32xf32, #tpu.memory_space<vmem>>, vector<1x1x32xf32>
    %21 = vector.shape_cast %20 : vector<1x1x32xf32> to vector<1x32xf32>
    %c0_32 = arith.constant 0 : index
    %c0_33 = arith.constant 0 : index
    %c0_34 = arith.constant 0 : index
    %22 = vector.load %arg14[%c0_32, %c0_33, %c0_34] : memref<1x1x128xf32, #tpu.memory_space<vmem>>, vector<1x1x128xf32>
    %23 = vector.shape_cast %22 : vector<1x1x128xf32> to vector<1x128xf32>
    %c0_35 = arith.constant 0 : index
    %c0_36 = arith.constant 0 : index
    %c0_37 = arith.constant 0 : index
    %24 = vector.load %arg2[%c0_35, %c0_36, %c0_37] : memref<1x16x128xf32, #tpu.memory_space<vmem>>, vector<1x16x128xf32>
    %25 = vector.shape_cast %24 : vector<1x16x128xf32> to vector<16x128xf32>
    %26 = arith.truncf %25 : vector<16x128xf32> to vector<16x128xbf16>
    %cst = arith.constant dense<0.000000e+00> : vector<16x512xf32>
    %27 = tpu.matmul %26, %1, %cst {dimension_numbers = #tpu.dot_dimension_numbers<[1], [0], [0], [1], [0, 0, 1, 1], [], []>} : vector<16x128xbf16>, vector<128x512xbf16>, vector<16x512xf32> -> vector<16x512xf32>
    %28 = vector.broadcast %13 : vector<1x512xf32> to vector<16x512xf32>
    %29 = arith.addf %27, %28 : vector<16x512xf32>
    %cst_38 = arith.constant 0.000000e+00 : f32
    %30 = vector.broadcast %cst_38 : f32 to vector<16x512xf32>
    %31 = arith.cmpf ogt, %29, %30 : vector<16x512xf32>
    %cst_39 = arith.constant 0.00999999977 : f32
    %32 = vector.broadcast %cst_39 : f32 to vector<16x512xf32>
    %33 = arith.mulf %32, %29 : vector<16x512xf32>
    %34 = arith.select %31, %29, %33 : vector<16x512xi1>, vector<16x512xf32>
    %35 = arith.truncf %34 : vector<16x512xf32> to vector<16x512xbf16>
    %cst_40 = arith.constant dense<0.000000e+00> : vector<16x256xf32>
    %36 = tpu.matmul %35, %3, %cst_40 {dimension_numbers = #tpu.dot_dimension_numbers<[1], [0], [0], [1], [0, 0, 1, 1], [], []>} : vector<16x512xbf16>, vector<512x256xbf16>, vector<16x256xf32> -> vector<16x256xf32>
    %37 = vector.broadcast %15 : vector<1x256xf32> to vector<16x256xf32>
    %38 = arith.addf %36, %37 : vector<16x256xf32>
    %cst_41 = arith.constant 0.000000e+00 : f32
    %39 = vector.broadcast %cst_41 : f32 to vector<16x256xf32>
    %40 = arith.cmpf ogt, %38, %39 : vector<16x256xf32>
    %cst_42 = arith.constant 0.00999999977 : f32
    %41 = vector.broadcast %cst_42 : f32 to vector<16x256xf32>
    %42 = arith.mulf %41, %38 : vector<16x256xf32>
    %43 = arith.select %40, %38, %42 : vector<16x256xi1>, vector<16x256xf32>
    %44 = arith.truncf %43 : vector<16x256xf32> to vector<16x256xbf16>
    %cst_43 = arith.constant dense<0.000000e+00> : vector<16x128xf32>
    %45 = tpu.matmul %44, %5, %cst_43 {dimension_numbers = #tpu.dot_dimension_numbers<[1], [0], [0], [1], [0, 0, 1, 1], [], []>} : vector<16x256xbf16>, vector<256x128xbf16>, vector<16x128xf32> -> vector<16x128xf32>
    %46 = vector.broadcast %17 : vector<1x128xf32> to vector<16x128xf32>
    %47 = arith.addf %45, %46 : vector<16x128xf32>
    %cst_44 = arith.constant 0.000000e+00 : f32
    %48 = vector.broadcast %cst_44 : f32 to vector<16x128xf32>
    %49 = arith.cmpf ogt, %47, %48 : vector<16x128xf32>
    %cst_45 = arith.constant 0.00999999977 : f32
    %50 = vector.broadcast %cst_45 : f32 to vector<16x128xf32>
    %51 = arith.mulf %50, %47 : vector<16x128xf32>
    %52 = arith.select %49, %47, %51 : vector<16x128xi1>, vector<16x128xf32>
    %53 = arith.truncf %52 : vector<16x128xf32> to vector<16x128xbf16>
    %cst_46 = arith.constant dense<0.000000e+00> : vector<16x64xf32>
    %54 = tpu.matmul %53, %7, %cst_46 {dimension_numbers = #tpu.dot_dimension_numbers<[1], [0], [0], [1], [0, 0, 1, 1], [], []>} : vector<16x128xbf16>, vector<128x64xbf16>, vector<16x64xf32> -> vector<16x64xf32>
    %55 = vector.broadcast %19 : vector<1x64xf32> to vector<16x64xf32>
    %56 = arith.addf %54, %55 : vector<16x64xf32>
    %cst_47 = arith.constant 0.000000e+00 : f32
    %57 = vector.broadcast %cst_47 : f32 to vector<16x64xf32>
    %58 = arith.cmpf ogt, %56, %57 : vector<16x64xf32>
    %cst_48 = arith.constant 0.00999999977 : f32
    %59 = vector.broadcast %cst_48 : f32 to vector<16x64xf32>
    %60 = arith.mulf %59, %56 : vector<16x64xf32>
    %61 = arith.select %58, %56, %60 : vector<16x64xi1>, vector<16x64xf32>
    %62 = arith.truncf %61 : vector<16x64xf32> to vector<16x64xbf16>
    %cst_49 = arith.constant dense<0.000000e+00> : vector<16x32xf32>
    %63 = tpu.matmul %62, %9, %cst_49 {dimension_numbers = #tpu.dot_dimension_numbers<[1], [0], [0], [1], [0, 0, 1, 1], [], []>} : vector<16x64xbf16>, vector<64x32xbf16>, vector<16x32xf32> -> vector<16x32xf32>
    %64 = vector.broadcast %21 : vector<1x32xf32> to vector<16x32xf32>
    %65 = arith.addf %63, %64 : vector<16x32xf32>
    %cst_50 = arith.constant 0.000000e+00 : f32
    %66 = vector.broadcast %cst_50 : f32 to vector<16x32xf32>
    %67 = arith.cmpf ogt, %65, %66 : vector<16x32xf32>
    %cst_51 = arith.constant 0.00999999977 : f32
    %68 = vector.broadcast %cst_51 : f32 to vector<16x32xf32>
    %69 = arith.mulf %68, %65 : vector<16x32xf32>
    %70 = arith.select %67, %65, %69 : vector<16x32xi1>, vector<16x32xf32>
    %71 = arith.truncf %70 : vector<16x32xf32> to vector<16x32xbf16>
    %cst_52 = arith.constant dense<0.000000e+00> : vector<16x128xf32>
    %72 = tpu.matmul %71, %11, %cst_52 {dimension_numbers = #tpu.dot_dimension_numbers<[1], [0], [0], [1], [0, 0, 1, 1], [], []>} : vector<16x32xbf16>, vector<32x128xbf16>, vector<16x128xf32> -> vector<16x128xf32>
    %73 = vector.broadcast %23 : vector<1x128xf32> to vector<16x128xf32>
    %74 = arith.addf %72, %73 : vector<16x128xf32>
    %cst_53 = arith.constant 0.000000e+00 : f32
    %75 = vector.broadcast %cst_53 : f32 to vector<16x128xf32>
    %76 = arith.cmpf ogt, %74, %75 : vector<16x128xf32>
    %cst_54 = arith.constant 0.00999999977 : f32
    %77 = vector.broadcast %cst_54 : f32 to vector<16x128xf32>
    %78 = arith.mulf %77, %74 : vector<16x128xf32>
    %79 = arith.select %76, %74, %78 : vector<16x128xi1>, vector<16x128xf32>
    %80 = arith.addf %79, %25 : vector<16x128xf32>
    %81 = arith.truncf %80 : vector<16x128xf32> to vector<16x128xbf16>
    %cst_55 = arith.constant dense<0.000000e+00> : vector<16x512xf32>
    %82 = tpu.matmul %81, %1, %cst_55 {dimension_numbers = #tpu.dot_dimension_numbers<[1], [0], [0], [1], [0, 0, 1, 1], [], []>} : vector<16x128xbf16>, vector<128x512xbf16>, vector<16x512xf32> -> vector<16x512xf32>
    %83 = vector.broadcast %13 : vector<1x512xf32> to vector<16x512xf32>
    %84 = arith.addf %82, %83 : vector<16x512xf32>
    %cst_56 = arith.constant 0.000000e+00 : f32
    %85 = vector.broadcast %cst_56 : f32 to vector<16x512xf32>
    %86 = arith.cmpf ogt, %84, %85 : vector<16x512xf32>
    %cst_57 = arith.constant 0.00999999977 : f32
    %87 = vector.broadcast %cst_57 : f32 to vector<16x512xf32>
    %88 = arith.mulf %87, %84 : vector<16x512xf32>
    %89 = arith.select %86, %84, %88 : vector<16x512xi1>, vector<16x512xf32>
    %90 = arith.truncf %89 : vector<16x512xf32> to vector<16x512xbf16>
    %cst_58 = arith.constant dense<0.000000e+00> : vector<16x256xf32>
    %91 = tpu.matmul %90, %3, %cst_58 {dimension_numbers = #tpu.dot_dimension_numbers<[1], [0], [0], [1], [0, 0, 1, 1], [], []>} : vector<16x512xbf16>, vector<512x256xbf16>, vector<16x256xf32> -> vector<16x256xf32>
    %92 = vector.broadcast %15 : vector<1x256xf32> to vector<16x256xf32>
    %93 = arith.addf %91, %92 : vector<16x256xf32>
    %cst_59 = arith.constant 0.000000e+00 : f32
    %94 = vector.broadcast %cst_59 : f32 to vector<16x256xf32>
    %95 = arith.cmpf ogt, %93, %94 : vector<16x256xf32>
    %cst_60 = arith.constant 0.00999999977 : f32
    %96 = vector.broadcast %cst_60 : f32 to vector<16x256xf32>
    %97 = arith.mulf %96, %93 : vector<16x256xf32>
    %98 = arith.select %95, %93, %97 : vector<16x256xi1>, vector<16x256xf32>
    %99 = arith.truncf %98 : vector<16x256xf32> to vector<16x256xbf16>
    %cst_61 = arith.constant dense<0.000000e+00> : vector<16x128xf32>
    %100 = tpu.matmul %99, %5, %cst_61 {dimension_numbers = #tpu.dot_dimension_numbers<[1], [0], [0], [1], [0, 0, 1, 1], [], []>} : vector<16x256xbf16>, vector<256x128xbf16>, vector<16x128xf32> -> vector<16x128xf32>
    %101 = vector.broadcast %17 : vector<1x128xf32> to vector<16x128xf32>
    %102 = arith.addf %100, %101 : vector<16x128xf32>
    %cst_62 = arith.constant 0.000000e+00 : f32
    %103 = vector.broadcast %cst_62 : f32 to vector<16x128xf32>
    %104 = arith.cmpf ogt, %102, %103 : vector<16x128xf32>
    %cst_63 = arith.constant 0.00999999977 : f32
    %105 = vector.broadcast %cst_63 : f32 to vector<16x128xf32>
    %106 = arith.mulf %105, %102 : vector<16x128xf32>
    %107 = arith.select %104, %102, %106 : vector<16x128xi1>, vector<16x128xf32>
    %108 = arith.truncf %107 : vector<16x128xf32> to vector<16x128xbf16>
    %cst_64 = arith.constant dense<0.000000e+00> : vector<16x64xf32>
    %109 = tpu.matmul %108, %7, %cst_64 {dimension_numbers = #tpu.dot_dimension_numbers<[1], [0], [0], [1], [0, 0, 1, 1], [], []>} : vector<16x128xbf16>, vector<128x64xbf16>, vector<16x64xf32> -> vector<16x64xf32>
    %110 = vector.broadcast %19 : vector<1x64xf32> to vector<16x64xf32>
    %111 = arith.addf %109, %110 : vector<16x64xf32>
    %cst_65 = arith.constant 0.000000e+00 : f32
    %112 = vector.broadcast %cst_65 : f32 to vector<16x64xf32>
    %113 = arith.cmpf ogt, %111, %112 : vector<16x64xf32>
    %cst_66 = arith.constant 0.00999999977 : f32
    %114 = vector.broadcast %cst_66 : f32 to vector<16x64xf32>
    %115 = arith.mulf %114, %111 : vector<16x64xf32>
    %116 = arith.select %113, %111, %115 : vector<16x64xi1>, vector<16x64xf32>
    %117 = arith.truncf %116 : vector<16x64xf32> to vector<16x64xbf16>
    %cst_67 = arith.constant dense<0.000000e+00> : vector<16x32xf32>
    %118 = tpu.matmul %117, %9, %cst_67 {dimension_numbers = #tpu.dot_dimension_numbers<[1], [0], [0], [1], [0, 0, 1, 1], [], []>} : vector<16x64xbf16>, vector<64x32xbf16>, vector<16x32xf32> -> vector<16x32xf32>
    %119 = vector.broadcast %21 : vector<1x32xf32> to vector<16x32xf32>
    %120 = arith.addf %118, %119 : vector<16x32xf32>
    %cst_68 = arith.constant 0.000000e+00 : f32
    %121 = vector.broadcast %cst_68 : f32 to vector<16x32xf32>
    %122 = arith.cmpf ogt, %120, %121 : vector<16x32xf32>
    %cst_69 = arith.constant 0.00999999977 : f32
    %123 = vector.broadcast %cst_69 : f32 to vector<16x32xf32>
    %124 = arith.mulf %123, %120 : vector<16x32xf32>
    %125 = arith.select %122, %120, %124 : vector<16x32xi1>, vector<16x32xf32>
    %126 = arith.truncf %125 : vector<16x32xf32> to vector<16x32xbf16>
    %cst_70 = arith.constant dense<0.000000e+00> : vector<16x128xf32>
    %127 = tpu.matmul %126, %11, %cst_70 {dimension_numbers = #tpu.dot_dimension_numbers<[1], [0], [0], [1], [0, 0, 1, 1], [], []>} : vector<16x32xbf16>, vector<32x128xbf16>, vector<16x128xf32> -> vector<16x128xf32>
    %128 = vector.broadcast %23 : vector<1x128xf32> to vector<16x128xf32>
    %129 = arith.addf %127, %128 : vector<16x128xf32>
    %cst_71 = arith.constant 0.000000e+00 : f32
    %130 = vector.broadcast %cst_71 : f32 to vector<16x128xf32>
    %131 = arith.cmpf ogt, %129, %130 : vector<16x128xf32>
    %cst_72 = arith.constant 0.00999999977 : f32
    %132 = vector.broadcast %cst_72 : f32 to vector<16x128xf32>
    %133 = arith.mulf %132, %129 : vector<16x128xf32>
    %134 = arith.select %131, %129, %133 : vector<16x128xi1>, vector<16x128xf32>
    %135 = arith.addf %134, %25 : vector<16x128xf32>
    %136 = arith.truncf %135 : vector<16x128xf32> to vector<16x128xbf16>
    %cst_73 = arith.constant dense<0.000000e+00> : vector<16x512xf32>
    %137 = tpu.matmul %136, %1, %cst_73 {dimension_numbers = #tpu.dot_dimension_numbers<[1], [0], [0], [1], [0, 0, 1, 1], [], []>} : vector<16x128xbf16>, vector<128x512xbf16>, vector<16x512xf32> -> vector<16x512xf32>
    %138 = vector.broadcast %13 : vector<1x512xf32> to vector<16x512xf32>
    %139 = arith.addf %137, %138 : vector<16x512xf32>
    %cst_74 = arith.constant 0.000000e+00 : f32
    %140 = vector.broadcast %cst_74 : f32 to vector<16x512xf32>
    %141 = arith.cmpf ogt, %139, %140 : vector<16x512xf32>
    %cst_75 = arith.constant 0.00999999977 : f32
    %142 = vector.broadcast %cst_75 : f32 to vector<16x512xf32>
    %143 = arith.mulf %142, %139 : vector<16x512xf32>
    %144 = arith.select %141, %139, %143 : vector<16x512xi1>, vector<16x512xf32>
    %145 = arith.truncf %144 : vector<16x512xf32> to vector<16x512xbf16>
    %cst_76 = arith.constant dense<0.000000e+00> : vector<16x256xf32>
    %146 = tpu.matmul %145, %3, %cst_76 {dimension_numbers = #tpu.dot_dimension_numbers<[1], [0], [0], [1], [0, 0, 1, 1], [], []>} : vector<16x512xbf16>, vector<512x256xbf16>, vector<16x256xf32> -> vector<16x256xf32>
    %147 = vector.broadcast %15 : vector<1x256xf32> to vector<16x256xf32>
    %148 = arith.addf %146, %147 : vector<16x256xf32>
    %cst_77 = arith.constant 0.000000e+00 : f32
    %149 = vector.broadcast %cst_77 : f32 to vector<16x256xf32>
    %150 = arith.cmpf ogt, %148, %149 : vector<16x256xf32>
    %cst_78 = arith.constant 0.00999999977 : f32
    %151 = vector.broadcast %cst_78 : f32 to vector<16x256xf32>
    %152 = arith.mulf %151, %148 : vector<16x256xf32>
    %153 = arith.select %150, %148, %152 : vector<16x256xi1>, vector<16x256xf32>
    %154 = arith.truncf %153 : vector<16x256xf32> to vector<16x256xbf16>
    %cst_79 = arith.constant dense<0.000000e+00> : vector<16x128xf32>
    %155 = tpu.matmul %154, %5, %cst_79 {dimension_numbers = #tpu.dot_dimension_numbers<[1], [0], [0], [1], [0, 0, 1, 1], [], []>} : vector<16x256xbf16>, vector<256x128xbf16>, vector<16x128xf32> -> vector<16x128xf32>
    %156 = vector.broadcast %17 : vector<1x128xf32> to vector<16x128xf32>
    %157 = arith.addf %155, %156 : vector<16x128xf32>
    %cst_80 = arith.constant 0.000000e+00 : f32
    %158 = vector.broadcast %cst_80 : f32 to vector<16x128xf32>
    %159 = arith.cmpf ogt, %157, %158 : vector<16x128xf32>
    %cst_81 = arith.constant 0.00999999977 : f32
    %160 = vector.broadcast %cst_81 : f32 to vector<16x128xf32>
    %161 = arith.mulf %160, %157 : vector<16x128xf32>
    %162 = arith.select %159, %157, %161 : vector<16x128xi1>, vector<16x128xf32>
    %163 = arith.truncf %162 : vector<16x128xf32> to vector<16x128xbf16>
    %cst_82 = arith.constant dense<0.000000e+00> : vector<16x64xf32>
    %164 = tpu.matmul %163, %7, %cst_82 {dimension_numbers = #tpu.dot_dimension_numbers<[1], [0], [0], [1], [0, 0, 1, 1], [], []>} : vector<16x128xbf16>, vector<128x64xbf16>, vector<16x64xf32> -> vector<16x64xf32>
    %165 = vector.broadcast %19 : vector<1x64xf32> to vector<16x64xf32>
    %166 = arith.addf %164, %165 : vector<16x64xf32>
    %cst_83 = arith.constant 0.000000e+00 : f32
    %167 = vector.broadcast %cst_83 : f32 to vector<16x64xf32>
    %168 = arith.cmpf ogt, %166, %167 : vector<16x64xf32>
    %cst_84 = arith.constant 0.00999999977 : f32
    %169 = vector.broadcast %cst_84 : f32 to vector<16x64xf32>
    %170 = arith.mulf %169, %166 : vector<16x64xf32>
    %171 = arith.select %168, %166, %170 : vector<16x64xi1>, vector<16x64xf32>
    %172 = arith.truncf %171 : vector<16x64xf32> to vector<16x64xbf16>
    %cst_85 = arith.constant dense<0.000000e+00> : vector<16x32xf32>
    %173 = tpu.matmul %172, %9, %cst_85 {dimension_numbers = #tpu.dot_dimension_numbers<[1], [0], [0], [1], [0, 0, 1, 1], [], []>} : vector<16x64xbf16>, vector<64x32xbf16>, vector<16x32xf32> -> vector<16x32xf32>
    %174 = vector.broadcast %21 : vector<1x32xf32> to vector<16x32xf32>
    %175 = arith.addf %173, %174 : vector<16x32xf32>
    %cst_86 = arith.constant 0.000000e+00 : f32
    %176 = vector.broadcast %cst_86 : f32 to vector<16x32xf32>
    %177 = arith.cmpf ogt, %175, %176 : vector<16x32xf32>
    %cst_87 = arith.constant 0.00999999977 : f32
    %178 = vector.broadcast %cst_87 : f32 to vector<16x32xf32>
    %179 = arith.mulf %178, %175 : vector<16x32xf32>
    %180 = arith.select %177, %175, %179 : vector<16x32xi1>, vector<16x32xf32>
    %181 = arith.truncf %180 : vector<16x32xf32> to vector<16x32xbf16>
    %cst_88 = arith.constant dense<0.000000e+00> : vector<16x128xf32>
    %182 = tpu.matmul %181, %11, %cst_88 {dimension_numbers = #tpu.dot_dimension_numbers<[1], [0], [0], [1], [0, 0, 1, 1], [], []>} : vector<16x32xbf16>, vector<32x128xbf16>, vector<16x128xf32> -> vector<16x128xf32>
    %183 = vector.broadcast %23 : vector<1x128xf32> to vector<16x128xf32>
    %184 = arith.addf %182, %183 : vector<16x128xf32>
    %cst_89 = arith.constant 0.000000e+00 : f32
    %185 = vector.broadcast %cst_89 : f32 to vector<16x128xf32>
    %186 = arith.cmpf ogt, %184, %185 : vector<16x128xf32>
    %cst_90 = arith.constant 0.00999999977 : f32
    %187 = vector.broadcast %cst_90 : f32 to vector<16x128xf32>
    %188 = arith.mulf %187, %184 : vector<16x128xf32>
    %189 = arith.select %186, %184, %188 : vector<16x128xi1>, vector<16x128xf32>
    %190 = arith.addf %189, %25 : vector<16x128xf32>
    %c0_91 = arith.constant 0 : index
    %c0_92 = arith.constant 0 : index
    %c0_93 = arith.constant 0 : index
    %191 = vector.load %arg15[%c0_91, %c0_92, %c0_93] : memref<1x16x128xf32, #tpu.memory_space<vmem>>, vector<1x16x128xf32>
    %192 = vector.shape_cast %191 : vector<1x16x128xf32> to vector<16x128xf32>
    %193 = vector.shape_cast %190 : vector<16x128xf32> to vector<1x16x128xf32>
    tpu.vector_store %arg15[%c0_91, %c0_92, %c0_93], %193 {strides = array<i32>} : memref<1x16x128xf32, #tpu.memory_space<vmem>>, vector<1x16x128xf32>,
    return
  }
  func.func @transform_0(%arg0: i32, %arg1: i32) -> (i32, i32, i32) {
    %c0_i32 = arith.constant 0 : i32
    %c0_i32_0 = arith.constant 0 : i32
    return %arg0, %arg1, %c0_i32 : i32, i32, i32
  }
  func.func @transform_1(%arg0: i32, %arg1: i32) -> (i32, i32, i32) {
    %c0_i32 = arith.constant 0 : i32
    %c0_i32_0 = arith.constant 0 : i32
    %c0_i32_1 = arith.constant 0 : i32
    return %arg0, %c0_i32, %c0_i32_0 : i32, i32, i32
  }
  func.func @transform_2(%arg0: i32, %arg1: i32) -> (i32, i32, i32) {
    %c0_i32 = arith.constant 0 : i32
    %c0_i32_0 = arith.constant 0 : i32
    %c0_i32_1 = arith.constant 0 : i32
    return %arg0, %c0_i32, %c0_i32_0 : i32, i32, i32
  }
  func.func @transform_3(%arg0: i32, %arg1: i32) -> (i32, i32, i32) {
    %c0_i32 = arith.constant 0 : i32
    %c0_i32_0 = arith.constant 0 : i32
    %c0_i32_1 = arith.constant 0 : i32
    return %arg0, %c0_i32, %c0_i32_0 : i32, i32, i32
  }
  func.func @transform_4(%arg0: i32, %arg1: i32) -> (i32, i32, i32) {
    %c0_i32 = arith.constant 0 : i32
    %c0_i32_0 = arith.constant 0 : i32
    %c0_i32_1 = arith.constant 0 : i32
    return %arg0, %c0_i32, %c0_i32_0 : i32, i32, i32
  }
  func.func @transform_5(%arg0: i32, %arg1: i32) -> (i32, i32, i32) {
    %c0_i32 = arith.constant 0 : i32
    %c0_i32_0 = arith.constant 0 : i32
    %c0_i32_1 = arith.constant 0 : i32
    return %arg0, %c0_i32, %c0_i32_0 : i32, i32, i32
  }
  func.func @transform_6(%arg0: i32, %arg1: i32) -> (i32, i32, i32) {
    %c0_i32 = arith.constant 0 : i32
    %c0_i32_0 = arith.constant 0 : i32
    %c0_i32_1 = arith.constant 0 : i32
    return %arg0, %c0_i32, %c0_i32_0 : i32, i32, i32
  }
  func.func @transform_7(%arg0: i32, %arg1: i32) -> (i32, i32, i32) {
    %c0_i32 = arith.constant 0 : i32
    %c0_i32_0 = arith.constant 0 : i32
    %c0_i32_1 = arith.constant 0 : i32
    return %arg0, %c0_i32, %c0_i32_0 : i32, i32, i32
  }
  func.func @transform_8(%arg0: i32, %arg1: i32) -> (i32, i32, i32) {
    %c0_i32 = arith.constant 0 : i32
    %c0_i32_0 = arith.constant 0 : i32
    %c0_i32_1 = arith.constant 0 : i32
    return %arg0, %c0_i32, %c0_i32_0 : i32, i32, i32
  }
  func.func @transform_9(%arg0: i32, %arg1: i32) -> (i32, i32, i32) {
    %c0_i32 = arith.constant 0 : i32
    %c0_i32_0 = arith.constant 0 : i32
    %c0_i32_1 = arith.constant 0 : i32
    return %arg0, %c0_i32, %c0_i32_0 : i32, i32, i32
  }
  func.func @transform_10(%arg0: i32, %arg1: i32) -> (i32, i32, i32) {
    %c0_i32 = arith.constant 0 : i32
    %c0_i32_0 = arith.constant 0 : i32
    %c0_i32_1 = arith.constant 0 : i32
    return %arg0, %c0_i32, %c0_i32_0 : i32, i32, i32
  }
  func.func @transform_11(%arg0: i32, %arg1: i32) -> (i32, i32, i32) {
    %c0_i32 = arith.constant 0 : i32
    %c0_i32_0 = arith.constant 0 : i32
    %c0_i32_1 = arith.constant 0 : i32
    return %arg0, %c0_i32, %c0_i32_0 : i32, i32, i32
  }
  func.func @transform_12(%arg0: i32, %arg1: i32) -> (i32, i32, i32) {
    %c0_i32 = arith.constant 0 : i32
    %c0_i32_0 = arith.constant 0 : i32
    %c0_i32_1 = arith.constant 0 : i32
    return %arg0, %c0_i32, %c0_i32_0 : i32, i32, i32
  }
  func.func @transform_13(%arg0: i32, %arg1: i32) -> (i32, i32, i32) {
    %c0_i32 = arith.constant 0 : i32
    %c0_i32_0 = arith.constant 0 : i32
    return %arg0, %arg1, %c0_i32 : i32, i32, i32
  }
}

</mosaic_0001>

<bundles_post_ra>
// kernel: clst_forward.1
= control target key start
LH: loop header
LB: loop body
LE: loop exit
PB: predicated region body
PF: predicated region fallthrough
CT: control target
= control target key end

     0   :  { %s3896_s25 = smov 0   ;;  %s3898_s26 = smov 0   ;;  %s4957_s0 = inlined_call_operand.vmem [shape: f32[4,16,128], index: 0, kind: input, shape index: {}]   ;;  %s4958_s1 = inlined_call_operand.vmem [shape: bf16[4,128,512], index: 1, kind: input, shape index: {}]   ;;  %s4959_s2 = inlined_call_operand.vmem [shape: f32[4,1,512], index: 2, kind: input, shape index: {}]   ;;  %s4960_s3 = inlined_call_operand.vmem [shape: bf16[4,512,256], index: 3, kind: input, shape index: {}]   ;;  %s4961_s4 = inlined_call_operand.vmem [shape: f32[4,1,256], index: 4, kind: input, shape index: {}]   ;;  %s4962_s5 = inlined_call_operand.vmem [shape: bf16[4,256,128], index: 5, kind: input, shape index: {}]   ;;  %s4963_s6 = inlined_call_operand.vmem [shape: f32[4,1,128], index: 6, kind: input, shape index: {}]   ;;  %s4964_s7 = inlined_call_operand.vmem [shape: bf16[4,128,64], index: 7, kind: input, shape index: {}]   ;;  %s4965_s8 = inlined_call_operand.vmem [shape: f32[4,1,64], index: 8, kind: input, shape index: {}]   ;;  %s4966_s9 = inlined_call_operand.vmem [shape: bf16[4,64,32], index: 9, kind: input, shape index: {}]   ;;  %s4967_s10 = inlined_call_operand.vmem [shape: f32[4,1,32], index: 10, kind: input, shape index: {}]   ;;  %s4968_s11 = inlined_call_operand.vmem [shape: bf16[4,32,128], index: 11, kind: input, shape index: {}]   ;;  %s4969_s12 = inlined_call_operand.vmem [shape: f32[4,1,128], index: 12, kind: input, shape index: {}]   ;;  %s4970_s13 = inlined_call_operand.vmem [shape: f32[4,16,128], index: 13, kind: output, shape index: {}]  }
   0x1   :  { %5040 = sst [smem:[#allocation52_spill]] %s4957_s0  ;;  %s3900_s27 = smov 0  }
   0x2 LB: > { %s35_s28 = sadd.s32 1, %s3817_s26  ;;  %p3040_p0 = scmp.ge.s32.totalorder %s3821_s27, 1  ;;  %s3821_s27 = sphi %s3900_s27, %s23_s27   ;;  %s3817_s26 = sphi %s3898_s26, %s5151_s26   ;;  %s3813_s25 = sphi %s3896_s25, %s5150_s25  }
   0x3   : > { %p37_p1 = scmp.ge.s32.totalorder %s35_s28, 4  ;;  %p518_p2 = scmp.lt.s32.totalorder %s3821_s27, 5 }
   0x5   : > { %s5153_s28 = smov (%p37_p1, %s35_s28), 0  ;;  %p519_p3 = pnand %p3040_p0, %p518_p2 }
   0x7   : > { %522 = sbr.rel (%p519_p3) target bundleno = 4250 (0x109a), region = 72 }
   0xe   : > { %p621_p4 = scmp.lt.s32.totalorder %s3813_s25, 3  ;;  %v4971_v0 = vmov 0   ;;  %s5041_s0 = sld [smem:[#allocation52_spill]]  ;;  %vm3825_vm12 = vmmov 0  }
   0xf   : > { %1069 = vmatprep.mubr.bf16.mxu0 %v4971_v0  ;;  %1112 = vmatprep.mubr.bf16.mxu1 %v4971_v0 }
  0x10   : > { %s5155_s25 = smov (!%p621_p4, %s3813_s25), 3 }
  0x11   : > { %s3198_s29 = sshll.u32 %s5155_s25, 8  ;;  %s3199_s16 = sshll.u32 %s5155_s25, 9 }
  0x12   : > { %s3922_s15 = scalar_lea.vmem %s4958_s1, %s3198_s29  ;;  %s3943_s17 = sshll.u32 %s5155_s25, 4 }
  0x13   : > { %v3493_v1 = vld [vmem:[%s3922_s15 + $0x4] ss:$16 sps:$4 sm:$0xff]   ;;  %v3495_v2 = vld [vmem:[%s3922_s15] ss:$16 sps:$4 sm:$0xff]   ;;  %v3517_v10 = vld [vmem:[%s3922_s15 + $0xc] ss:$16 sps:$4 sm:$0xff]   ;;  %s3951_s20 = scalar_lea.vmem %s4960_s3, %s3199_s16  ;;  %s4443_s29 = scalar_lea.vmem %s4965_s8, %s5155_s25 }
  0x14   : > { %1037 = vmatprep.subr.bf16.mxu0 %v3493_v1  ;;  %v3496_v3 = vld [vmem:[%s3922_s15 + $0x24] ss:$16 sps:$4 sm:$0xff]   ;;  %v3498_v4 = vld [vmem:[%s3922_s15 + $0x20] ss:$16 sps:$4 sm:$0xff]   ;;  %v3519_v11 = vld [vmem:[%s3922_s15 + $0x8] ss:$16 sps:$4 sm:$0xff]   ;;  %1080 = vmatprep.subr.bf16.mxu1 %v3517_v10  ;;  %s3958_s23 = scalar_lea.vmem %s5041_s0, %s3943_s17  ;;  %s4506_s19 = scalar_lea.vmem %s4967_s10, %s5155_s25 }
  0x15   : > { %1038 = vmatpush1.bf16.msra.mxu0 %v3495_v2  ;;  %v3499_v5 = vld [vmem:[%s3922_s15 + $0x44] ss:$16 sps:$4 sm:$0xff]   ;;  %v3501_v6 = vld [vmem:[%s3922_s15 + $0x40] ss:$16 sps:$4 sm:$0xff]   ;;  %v3520_v12 = vld [vmem:[%s3922_s15 + $0x2c] ss:$16 sps:$4 sm:$0xff]   ;;  %1081 = vmatpush1.bf16.msra.mxu1 %v3519_v11  ;;  %s4583_s0 = scalar_lea.vmem %s4969_s12, %s5155_s25 }
  0x16   : > { %1039 = vmatprep.subr.bf16.mxu0 %v3496_v3  ;;  %v3502_v7 = vld [vmem:[%s3922_s15 + $0x64] ss:$16 sps:$4 sm:$0xff]   ;;  %v3504_v8 = vld [vmem:[%s3922_s15 + $0x60] ss:$16 sps:$4 sm:$0xff]   ;;  %v3522_v14 = vld [vmem:[%s3922_s15 + $0x28] ss:$16 sps:$4 sm:$0xff]   ;;  %1082 = vmatprep.subr.bf16.mxu1 %v3520_v12 }
  0x17   : > { %v3505_v9 = vld [vmem:[%s3922_s15 + $0x84] ss:$16 sps:$4 sm:$0xff]   ;;  %v3507_v13 = vld [vmem:[%s3922_s15 + $0x80] ss:$16 sps:$4 sm:$0xff]   ;;  %v3523_v16 = vld [vmem:[%s3922_s15 + $0x4c] ss:$16 sps:$4 sm:$0xff]  }
  0x18   : > { %v3508_v15 = vld [vmem:[%s3922_s15 + $0xa4] ss:$16 sps:$4 sm:$0xff]   ;;  %v3510_v17 = vld [vmem:[%s3922_s15 + $0xa0] ss:$16 sps:$4 sm:$0xff]   ;;  %v3525_v18 = vld [vmem:[%s3922_s15 + $0x48] ss:$16 sps:$4 sm:$0xff]  }
  0x19   : > { %1040 = vmatpush1.bf16.msra.mxu0 %v3498_v4  ;;  %1083 = vmatpush1.bf16.msra.mxu1 %v3522_v14  ;;  %v3511_v19 = vld [vmem:[%s3922_s15 + $0xc4] ss:$16 sps:$4 sm:$0xff]   ;;  %v3526_v20 = vld [vmem:[%s3922_s15 + $0x6c] ss:$16 sps:$4 sm:$0xff]   ;;  %v3513_v21 = vld [vmem:[%s3922_s15 + $0xc0] ss:$16 sps:$4 sm:$0xff]  }
  0x1a   : > { %1041 = vmatprep.subr.bf16.mxu0 %v3499_v5  ;;  %1084 = vmatprep.subr.bf16.mxu1 %v3523_v16  ;;  %v3528_v22 = vld [vmem:[%s3922_s15 + $0x68] ss:$16 sps:$4 sm:$0xff]   ;;  %v3514_v23 = vld [vmem:[%s3922_s15 + $0xe4] ss:$16 sps:$4 sm:$0xff]   ;;  %v3529_v24 = vld [vmem:[%s3922_s15 + $0x8c] ss:$16 sps:$4 sm:$0xff]   ;;  %v857_v16 = vlaneseq }
  0x1b   : > { %v3516_v25 = vld [vmem:[%s3922_s15 + $0xe0] ss:$16 sps:$4 sm:$0xff]   ;;  %v854_v27 = vld [vmem:[%s3958_s23 + $0x8] sm:$0xff]  ;;  %v3978_v35 = vld [vmem:[%s3951_s20 + $0x14] ss:$8 sps:$4 sm:$0xff]   ;;  %s3200_s24 = sshll.u32 %s5155_s25, 7 }
  0x1c   : > { %v853_v26 = vld [vmem:[%s3958_s23] sm:$0xff]  ;;  %v3531_v28 = vld [vmem:[%s3922_s15 + $0x88] ss:$16 sps:$4 sm:$0xff]   ;;  %v3532_v29 = vld [vmem:[%s3922_s15 + $0xac] ss:$16 sps:$4 sm:$0xff]   ;;  %s4109_s14 = scalar_lea.vmem %s4962_s5, %s3200_s24  ;;  %s3045_s16 = sshll.u32 %s5155_s25, 2 }
  0x1d   : > { %1042 = vmatpush1.bf16.msra.mxu0 %v3501_v6  ;;  %1085 = vmatpush1.bf16.msra.mxu1 %v3525_v18  ;;  %v3969_v30 = vld [vmem:[%s3951_s20 + $0x4] ss:$8 sps:$4 sm:$0xff]   ;;  %v855_v31 = vpack.c.bf16 %v854_v27, %v853_v26  ;;  %v3534_v32 = vld [vmem:[%s3922_s15 + $0xa8] ss:$16 sps:$4 sm:$0xff]   ;;  %v3997_v42 = vld [vmem:[%s3951_s20 + $0x34] ss:$8 sps:$4 sm:$0xff]   ;;  %s638_s21 = scalar_lea.vmem %s4959_s2, %s3045_s16 }
  0x1e   : > { %1043 = vmatprep.subr.bf16.mxu0 %v3502_v7  ;;  %1086 = vmatprep.subr.bf16.mxu1 %v3526_v20  ;;  %v3973_v33 = vld [vmem:[%s3951_s20] ss:$8 sps:$4 sm:$0xff]   ;;  %v3535_v34 = vld [vmem:[%s3922_s15 + $0xcc] ss:$16 sps:$4 sm:$0xff]   ;;  %v3983_v37 = vld [vmem:[%s3951_s20 + $0x10] ss:$8 sps:$4 sm:$0xff]  }
  0x1f   : > { %v3537_v36 = vld [vmem:[%s3922_s15 + $0xc8] ss:$16 sps:$4 sm:$0xff]   ;;  %v3538_v38 = vld [vmem:[%s3922_s15 + $0xec] ss:$16 sps:$4 sm:$0xff]   ;;  %v4112_v6 = vld [vmem:[%s4109_s14 + $0x40] sm:$0xff]   ;;  %s3201_s22 = sshll.u32 %s5155_s25, 6 }
  0x20   : > { %v3988_v39 = vld [vmem:[%s3951_s20 + $0x24] ss:$8 sps:$4 sm:$0xff]   ;;  %v3540_v40 = vld [vmem:[%s3922_s15 + $0xe8] ss:$16 sps:$4 sm:$0xff]   ;;  %v4011_v46 = vld [vmem:[%s3951_s20 + $0x54] ss:$8 sps:$4 sm:$0xff]   ;;  %s4337_s30 = scalar_lea.vmem %s4964_s7, %s3201_s22 }
  0x21   : > { %1044 = vmatpush1.bf16.msra.mxu0 %v3504_v8  ;;  %1087 = vmatpush1.bf16.msra.mxu1 %v3528_v22  ;;  %v3993_v41 = vld [vmem:[%s3951_s20 + $0x20] ss:$8 sps:$4 sm:$0xff]   ;;  %v4000_v43 = vld [vmem:[%s3951_s20 + $0x30] ss:$8 sps:$4 sm:$0xff]   ;;  %v4003_v44 = vld [vmem:[%s3951_s20 + $0x44] ss:$8 sps:$4 sm:$0xff]  }
  0x22   : > { %1045 = vmatprep.subr.bf16.mxu0 %v3505_v9  ;;  %1088 = vmatprep.subr.bf16.mxu1 %v3529_v24  ;;  %v4008_v45 = vld [vmem:[%s3951_s20 + $0x40] ss:$8 sps:$4 sm:$0xff]   ;;  %v4016_v47 = vld [vmem:[%s3951_s20 + $0x50] ss:$8 sps:$4 sm:$0xff]   ;;  %v4019_v48 = vld [vmem:[%s3951_s20 + $0x64] ss:$8 sps:$4 sm:$0xff]  }
  0x23   : > { %v4025_v49 = vld [vmem:[%s3951_s20 + $0x60] ss:$8 sps:$4 sm:$0xff]   ;;  %v4029_v50 = vld [vmem:[%s3951_s20 + $0x74] ss:$8 sps:$4 sm:$0xff]   ;;  %v4033_v51 = vld [vmem:[%s3951_s20 + $0x70] ss:$8 sps:$4 sm:$0xff]  }
  0x24   : > { %v4037_v52 = vld [vmem:[%s3951_s20 + $0x84] ss:$8 sps:$4 sm:$0xff]   ;;  %v4041_v53 = vld [vmem:[%s3951_s20 + $0x80] ss:$8 sps:$4 sm:$0xff]   ;;  %v4045_v54 = vld [vmem:[%s3951_s20 + $0x94] ss:$8 sps:$4 sm:$0xff]  }
  0x25   : > { %1046 = vmatpush1.bf16.msra.mxu0 %v3507_v13  ;;  %1089 = vmatpush1.bf16.msra.mxu1 %v3531_v28  ;;  %v4049_v55 = vld [vmem:[%s3951_s20 + $0x90] ss:$8 sps:$4 sm:$0xff]   ;;  %v4053_v56 = vld [vmem:[%s3951_s20 + $0xa4] ss:$8 sps:$4 sm:$0xff]   ;;  %v4057_v57 = vld [vmem:[%s3951_s20 + $0xa0] ss:$8 sps:$4 sm:$0xff]  }
  0x26   : > { %1047 = vmatprep.subr.bf16.mxu0 %v3508_v15  ;;  %1090 = vmatprep.subr.bf16.mxu1 %v3532_v29  ;;  %v4061_v58 = vld [vmem:[%s3951_s20 + $0xb4] ss:$8 sps:$4 sm:$0xff]   ;;  %v4065_v59 = vld [vmem:[%s3951_s20 + $0xb0] ss:$8 sps:$4 sm:$0xff]   ;;  %v4069_v60 = vld [vmem:[%s3951_s20 + $0xc4] ss:$8 sps:$4 sm:$0xff]  }
  0x27   : > { %v4073_v61 = vld [vmem:[%s3951_s20 + $0xc0] ss:$8 sps:$4 sm:$0xff]   ;;  %v4077_v62 = vld [vmem:[%s3951_s20 + $0xd4] ss:$8 sps:$4 sm:$0xff]   ;;  %v4081_v63 = vld [vmem:[%s3951_s20 + $0xd0] ss:$8 sps:$4 sm:$0xff]  }
  0x28   : > { %v4086_v1 = vld [vmem:[%s3951_s20 + $0xe4] ss:$8 sps:$4 sm:$0xff]   ;;  %v4089_v2 = vld [vmem:[%s3951_s20 + $0xe0] ss:$8 sps:$4 sm:$0xff]   ;;  %v4094_v3 = vld [vmem:[%s3951_s20 + $0xf4] ss:$8 sps:$4 sm:$0xff]  }
  0x29   : > { %1048 = vmatpush1.bf16.msra.mxu0 %v3510_v17  ;;  %1091 = vmatpush1.bf16.msra.mxu1 %v3534_v32  ;;  %v4097_v4 = vld [vmem:[%s3951_s20 + $0xf0] ss:$8 sps:$4 sm:$0xff]   ;;  %v4102_v5 = vld [vmem:[%s3951_s20 + $0x104] ss:$8 sps:$4 sm:$0xff]   ;;  %v4152_v17 = vshrl.u32 %v857_v16, 7  ;;  %s3048_s16 = sshll.u32 %s5155_s25, 1 }
  0x2a   : > { %1049 = vmatprep.subr.bf16.mxu0 %v3511_v19  ;;  %1092 = vmatprep.subr.bf16.mxu1 %v3535_v34  ;;  %v4115_v7 = vld [vmem:[%s4109_s14] sm:$0xff]   ;;  %v4119_v8 = vld [vmem:[%s4109_s14 + $0x48] sm:$0xff]   ;;  %v4127_v10 = vld [vmem:[%s4109_s14 + $0x50] sm:$0xff]   ;;  %s3202_s22 = sshll.u32 %s5155_s25, 5 }
  0x2b   : > { %v4123_v9 = vld [vmem:[%s4109_s14 + $0x8] sm:$0xff]   ;;  %v4131_v11 = vld [vmem:[%s4109_s14 + $0x10] sm:$0xff]   ;;  %v4135_v12 = vld [vmem:[%s4109_s14 + $0x58] sm:$0xff]   ;;  %v4974_v18 = vsub.s32 0, %v4152_v17  ;;  %v4973_v20 = vsub.s32 1, %v4152_v17  ;;  %v871_v16 = vsub.s32 3, %v4152_v17 }
  0x2c   : > { %v4138_v13 = vld [vmem:[%s4109_s14 + $0x18] sm:$0xff]   ;;  %v4141_v14 = vld [vmem:[%s4109_s14 + $0x60] sm:$0xff]  }
  0x2d   : > { %1050 = vmatpush1.bf16.msra.mxu0 %v3513_v21  ;;  %1093 = vmatpush1.bf16.msra.mxu1 %v3537_v36  ;;  %5042 = vst [vmem:[#allocation2_spill] sm:$0xff] %v4141_v14  ;;  %v4147_v15 = vld [vmem:[%s4109_s14 + $0x20] sm:$0xff]  }
  0x2e   : > { %1051 = vmatprep.subr.bf16.mxu0 %v3514_v23  ;;  %1094 = vmatprep.subr.bf16.mxu1 %v3538_v38  ;;  %5043 = vst [vmem:[#allocation3_spill] sm:$0xff] %v4147_v15  ;;  %v847_v19 = vld [vmem:[%s638_s21] sm:$0xf]  ;;  %v867_v38 = vsub.s32 2, %v4152_v17  ;;  %s647_s21 = scalar_lea.vmem %s4961_s4, %s3048_s16  ;;  %s4404_s16 = scalar_lea.vmem %s4966_s9, %s3202_s22 }
  0x2f   : > { %v4161_v21 = vrot.slane %v847_v19, %v4974_v18  ;;  %v4165_v22 = vrot.slane %v847_v19, %v4973_v20  ;;  %s4487_s22 = scalar_lea.vmem %s4968_s11, %s3943_s17 }
  0x31   : > { %1052 = vmatpush1.bf16.msra.mxu0 %v3516_v25  ;;  %1095 = vmatpush1.bf16.msra.mxu1 %v3540_v40  ;;  %5044 = vst [vmem:[#allocation4_spill] sm:$0xff] %v4161_v21  ;;  %5045 = vst [vmem:[#allocation5_spill] sm:$0xff] %v4165_v22 }
  0x32   : > { %1482 = vmatprep.subr.bf16.mxu0 %v3969_v30  ;;  %3205 = vmatprep.subr.bf16.mxu1 %v4112_v6 }
  0x34   : > { %1070 = vmatmul.mubr.bf16.vlgmr.msra.gmra.mrb[0].mxu0 %v855_v31  ;;  %1113 = vmatmul.mubr.bf16.vlgmr.msra.gmra.mrb[0].mxu1 %v855_v31 }
  0x35   : > { %1483 = vmatpush1.bf16.msra.mxu0 %v3973_v33  ;;  %3206 = vmatpush3.bf16.msra.mxu1 %v4115_v7 }
  0x36   : > { %1484 = vmatprep.subr.bf16.mxu0 %v3978_v35  ;;  %3207 = vmatprep.subr.bf16.mxu1 %v4119_v8 }
  0x39   : > { %1485 = vmatpush1.bf16.msra.mxu0 %v3983_v37  ;;  %3208 = vmatpush3.bf16.msra.mxu1 %v4123_v9 }
  0x3a   : > { %1486 = vmatprep.subr.bf16.mxu0 %v3988_v39  ;;  %3209 = vmatprep.subr.bf16.mxu1 %v4127_v10 }
  0x3d   : > { %1487 = vmatpush1.bf16.msra.mxu0 %v3993_v41  ;;  %3210 = vmatpush3.bf16.msra.mxu1 %v4131_v11 }
  0x3e   : > { %1488 = vmatprep.subr.bf16.mxu0 %v3997_v42  ;;  %3211 = vmatprep.subr.bf16.mxu1 %v4135_v12 }
  0x41   : > { %1489 = vmatpush1.bf16.msra.mxu0 %v4000_v43  ;;  %3212 = vmatpush3.bf16.msra.mxu1 %v4138_v13 }
  0x42   : > { %1490 = vmatprep.subr.bf16.mxu0 %v4003_v44  ;;  %3213 = vmatprep.subr.bf16.mxu1 %v4141_v14 }
  0x45   : > { %1491 = vmatpush1.bf16.msra.mxu0 %v4008_v45  ;;  %3214 = vmatpush3.bf16.msra.mxu1 %v4147_v15  ;;  %v4181_v15 = vrot.slane %v847_v19, %v871_v16  ;;  %v4203_v16 = vld [vmem:[%s3951_s20 + $0x134] ss:$8 sps:$4 sm:$0xff]  }
  0x46   : > { %1492 = vmatprep.subr.bf16.mxu0 %v4011_v46  ;;  %5053 = vst [vmem:[#allocation13_spill] sm:$0xff] %v4203_v16 }
  0x47   : > { %5049 = vst [vmem:[#allocation9_spill] sm:$0xff] %v4181_v15 }
  0x49   : > { %1493 = vmatpush1.bf16.msra.mxu0 %v4016_v47 }
  0x4a   : > { %1494 = vmatprep.subr.bf16.mxu0 %v4019_v48 }
  0x4d   : > { %1495 = vmatpush1.bf16.msra.mxu0 %v4025_v49 }
  0x4e   : > { %1496 = vmatprep.subr.bf16.mxu0 %v4029_v50 }
  0x51   : > { %1497 = vmatpush1.bf16.msra.mxu0 %v4033_v51 }
  0x52   : > { %1498 = vmatprep.subr.bf16.mxu0 %v4037_v52 }
  0x55   : > { %1499 = vmatpush1.bf16.msra.mxu0 %v4041_v53 }
  0x56   : > { %1500 = vmatprep.subr.bf16.mxu0 %v4045_v54 }
  0x59   : > { %1501 = vmatpush1.bf16.msra.mxu0 %v4049_v55 }
  0x5a   : > { %1502 = vmatprep.subr.bf16.mxu0 %v4053_v56 }
  0x5d   : > { %1503 = vmatpush1.bf16.msra.mxu0 %v4057_v57 }
  0x5e   : > { %1504 = vmatprep.subr.bf16.mxu0 %v4061_v58 }
  0x61   : > { %1505 = vmatpush1.bf16.msra.mxu0 %v4065_v59 }
  0x62   : > { %1506 = vmatprep.subr.bf16.mxu0 %v4069_v60 }
  0x65   : > { %1507 = vmatpush1.bf16.msra.mxu0 %v4073_v61 }
  0x66   : > { %1508 = vmatprep.subr.bf16.mxu0 %v4077_v62 }
  0x69   : > { %1509 = vmatpush1.bf16.msra.mxu0 %v4081_v63 }
  0x6a   : > { %1510 = vmatprep.subr.bf16.mxu0 %v4086_v1 }
  0x6d   : > { %1511 = vmatpush1.bf16.msra.mxu0 %v4089_v2 }
  0x6e   : > { %1512 = vmatprep.subr.bf16.mxu0 %v4094_v3 }
  0x71   : > { %1513 = vmatpush1.bf16.msra.mxu0 %v4097_v4 }
  0x72   : > { %1525 = vmatprep.subr.bf16.mxu0 %v4102_v5 }
 0x107   : > { %v1071_v23 = vpop.f32.mrb[0].mxu0  ;;  %v1114_v14 = vpop.f32.mrb[0].mxu1 }
 0x108   : > { %v1072_v24 = vadd.f32 %v1071_v23, %v4161_v21  ;;  %v1073_v25 = vpop.f32.mrb[1].mxu0 }
 0x109   : > { %v1074_v26 = vadd.f32 %v1073_v25, %v4165_v22  ;;  %v1075_v27 = vpop.f32.mrb[2].mxu0 }
 0x10a   : > { %v1131_v28 = vmul.f32 0.01, %v1072_v24  ;;  %v1076_v29 = vadd.f32 %v1075_v27, %v4161_v21  ;;  %v1077_v31 = vpop.f32.mrb[3].mxu0  ;;  %vm1123_vm0 = vcmp.gt.f32.partialorder %v1072_v24, 0.0  ;;  %v4174_v21 = vld [vmem:[%s3951_s20 + $0x100] ss:$8 sps:$4 sm:$0xff]  }
 0x10b   : > { %v1132_v32 = vmul.f32 0.01, %v1074_v26  ;;  %v1078_v34 = vadd.f32 %v1077_v31, %v4165_v22  ;;  %vm1124_vm1 = vcmp.gt.f32.partialorder %v1074_v26, 0.0  ;;  %5046 = vst [vmem:[#allocation6_spill] sm:$0xff] %v4174_v21  ;;  %v4176_v31 = vrot.slane %v847_v19, %v867_v38  ;;  %v4179_v22 = vld [vmem:[%s3951_s20 + $0x114] ss:$8 sps:$4 sm:$0xff]  }
 0x10c   : > { %vm1127_vm2 = vcmp.gt.f32.partialorder %v1076_v29, 0.0  ;;  %v1135_v36 = vmul.f32 0.01, %v1076_v29  ;;  %v1139_v23 = vsel %vm1123_vm0, %v1072_v24, %v1131_v28  ;;  %5048 = vst [vmem:[#allocation8_spill] sm:$0xff] %v4179_v22  ;;  %v4185_v24 = vld [vmem:[%s3951_s20 + $0x110] ss:$8 sps:$4 sm:$0xff]  }
 0x10d   : > { %vm1128_vm3 = vcmp.gt.f32.partialorder %v1078_v34, 0.0  ;;  %v1136_v40 = vmul.f32 0.01, %v1078_v34  ;;  %v1140_v0 = vsel %vm1124_vm1, %v1074_v26, %v1132_v32  ;;  %5047 = vst [vmem:[#allocation7_spill] sm:$0xff] %v4176_v31  ;;  %5050 = vst [vmem:[#allocation10_spill] sm:$0xff] %v4185_v24  ;;  %v1115_v26 = vadd.f32 %v1114_v14, %v4176_v31  ;;  %v1116_v28 = vpop.f32.mrb[1].mxu1 }
 0x10e   : > { %v1143_v25 = vsel %vm1127_vm2, %v1076_v29, %v1135_v36  ;;  %v1118_v19 = vpop.f32.mrb[2].mxu1  ;;  %v4197_v14 = vld [vmem:[%s3951_s20 + $0x120] ss:$8 sps:$4 sm:$0xff]   ;;  %vm1864_vm1 = vcmask 523264  }
 0x10f   : > { %v1147_v27 = vpack.c.bf16 %v1143_v25, %v1139_v23  ;;  %v1144_v20 = vsel %vm1128_vm3, %v1078_v34, %v1136_v40  ;;  %vm1125_vm4 = vcmp.gt.f32.partialorder %v1115_v26, 0.0  ;;  %v1119_v29 = vadd.f32 %v1118_v19, %v4176_v31  ;;  %v1120_v32 = vpop.f32.mrb[3].mxu1  ;;  %5052 = vst [vmem:[#allocation12_spill] sm:$0xff] %v4197_v14 }
 0x110   : > { %v1148_v18 = vpack.c.bf16 %v1144_v20, %v1140_v0  ;;  %v4190_v0 = vld [vmem:[%s3951_s20 + $0x124] ss:$8 sps:$4 sm:$0xff]   ;;  %v1117_v20 = vadd.f32 %v1116_v28, %v4181_v15  ;;  %v1121_v36 = vadd.f32 %v1120_v32, %v4181_v15 }
 0x111   : > { %5051 = vst [vmem:[#allocation11_spill] sm:$0xff] %v4190_v0  ;;  %vm1129_vm6 = vcmp.gt.f32.partialorder %v1119_v29, 0.0  ;;  %v1137_v40 = vmul.f32 0.01, %v1119_v29  ;;  %v4212_v32 = vld [vmem:[%s3951_s20 + $0x144] ss:$8 sps:$4 sm:$0xff]  }
 0x112   : > { %1514 = vmatprep.mubr.bf16.mxu0 %v1148_v18  ;;  %v1133_v18 = vmul.f32 0.01, %v1115_v26  ;;  %vm1126_vm5 = vcmp.gt.f32.partialorder %v1117_v20, 0.0  ;;  %v1134_v34 = vmul.f32 0.01, %v1117_v20  ;;  %vm1130_vm7 = vcmp.gt.f32.partialorder %v1121_v36, 0.0 }
 0x113   : > { %1515 = vmatmul.mubr.bf16.vlgmr.msra.gmra.mrb[4].mxu0 %v1147_v27  ;;  %v1138_v23 = vmul.f32 0.01, %v1121_v36  ;;  %v1145_v27 = vsel %vm1129_vm6, %v1119_v29, %v1137_v40  ;;  %5055 = vst [vmem:[#allocation15_spill] sm:$0xff] %v4212_v32  ;;  %v4220_v29 = vld [vmem:[%s3951_s20 + $0x154] ss:$8 sps:$4 sm:$0xff]  }
 0x114   : > { %1526 = vmatpush1.bf16.msra.mxu0 %v4174_v21  ;;  %v4199_v38 = vsel %vm1125_vm4, %v1115_v26, %v1133_v18  ;;  %v1142_v25 = vsel %vm1126_vm5, %v1117_v20, %v1134_v34  ;;  %v4208_v26 = vld [vmem:[%s3951_s20 + $0x130] ss:$8 sps:$4 sm:$0xff]   ;;  %v4216_v20 = vld [vmem:[%s3951_s20 + $0x140] ss:$8 sps:$4 sm:$0xff]   ;;  %5057 = vst [vmem:[#allocation17_spill] sm:$0xff] %v4220_v29  ;;  %vm1934_vm4 = vcmask 261120  }
 0x115   : > { %1527 = vmatprep.subr.bf16.mxu0 %v4179_v22  ;;  %v1149_v28 = vpack.c.bf16 %v1145_v27, %v4199_v38  ;;  %v1146_v19 = vsel %vm1130_vm7, %v1121_v36, %v1138_v23  ;;  %5054 = vst [vmem:[#allocation14_spill] sm:$0xff] %v4208_v26  ;;  %5056 = vst [vmem:[#allocation16_spill] sm:$0xff] %v4216_v20  ;;  %v4224_v34 = vld [vmem:[%s3951_s20 + $0x150] ss:$8 sps:$4 sm:$0xff]   ;;  %v4228_v36 = vld [vmem:[%s3951_s20 + $0x164] ss:$8 sps:$4 sm:$0xff]  }
 0x116   : > { %v1150_v18 = vpack.c.bf16 %v1146_v19, %v1142_v25  ;;  %5058 = vst [vmem:[#allocation18_spill] sm:$0xff] %v4224_v34  ;;  %5059 = vst [vmem:[#allocation19_spill] sm:$0xff] %v4228_v36  ;;  %v4232_v38 = vld [vmem:[%s3951_s20 + $0x160] ss:$8 sps:$4 sm:$0xff]   ;;  %v4236_v40 = vld [vmem:[%s3951_s20 + $0x174] ss:$8 sps:$4 sm:$0xff]  }
 0x117   : > { %5060 = vst [vmem:[#allocation20_spill] sm:$0xff] %v4232_v38  ;;  %5061 = vst [vmem:[#allocation21_spill] sm:$0xff] %v4236_v40  ;;  %v4240_v23 = vld [vmem:[%s3951_s20 + $0x170] ss:$8 sps:$4 sm:$0xff]   ;;  %v4244_v25 = vld [vmem:[%s3951_s20 + $0x184] ss:$8 sps:$4 sm:$0xff]  }
 0x118   : > { %1528 = vmatpush1.bf16.msra.mxu0 %v4185_v24  ;;  %1557 = vmatprep.mubr.bf16.mxu0 %v1150_v18  ;;  %5062 = vst [vmem:[#allocation22_spill] sm:$0xff] %v4240_v23  ;;  %5063 = vst [vmem:[#allocation23_spill] sm:$0xff] %v4244_v25  ;;  %v4248_v27 = vld [vmem:[%s3951_s20 + $0x180] ss:$8 sps:$4 sm:$0xff]   ;;  %v4252_v19 = vld [vmem:[%s3951_s20 + $0x194] ss:$8 sps:$4 sm:$0xff]  }
 0x119   : > { %1529 = vmatprep.subr.bf16.mxu0 %v4190_v0  ;;  %5064 = vst [vmem:[#allocation24_spill] sm:$0xff] %v4248_v27  ;;  %5065 = vst [vmem:[#allocation25_spill] sm:$0xff] %v4252_v19  ;;  %v4256_v18 = vld [vmem:[%s3951_s20 + $0x190] ss:$8 sps:$4 sm:$0xff]   ;;  %v4357_v21 = vld [vmem:[%s4337_s30] sm:$0xff]  }
 0x11a   : > { %5066 = vst [vmem:[#allocation26_spill] sm:$0xff] %v4256_v18 }
 0x11c   : > { %1530 = vmatpush1.bf16.msra.mxu0 %v4197_v14 }
 0x11d   : > { %1531 = vmatprep.subr.bf16.mxu0 %v4203_v16 }
 0x120   : > { %1532 = vmatpush1.bf16.msra.mxu0 %v4208_v26 }
 0x121   : > { %1533 = vmatprep.subr.bf16.mxu0 %v4212_v32 }
 0x124   : > { %1534 = vmatpush1.bf16.msra.mxu0 %v4216_v20 }
 0x125   : > { %1535 = vmatprep.subr.bf16.mxu0 %v4220_v29 }
 0x128   : > { %1536 = vmatpush1.bf16.msra.mxu0 %v4224_v34  ;;  %v5081_v34 = vsub.s32 1, %v4152_v17 }
 0x129   : > { %1537 = vmatprep.subr.bf16.mxu0 %v4228_v36  ;;  %v5079_v36 = vsub.s32 0, %v4152_v17 }
 0x12c   : > { %1538 = vmatpush1.bf16.msra.mxu0 %v4232_v38  ;;  %v848_v38 = vld [vmem:[%s647_s21] sm:$0x3]  ;;  %s4420_s21 = scalar_lea.vmem %s4963_s6, %s5155_s25 }
 0x12d   : > { %1539 = vmatprep.subr.bf16.mxu0 %v4236_v40  ;;  %v4260_v40 = vld [vmem:[%s3951_s20 + $0x1a4] ss:$8 sps:$4 sm:$0xff]   ;;  %v4346_v15 = vrot.slane %v848_v38, %v5079_v36  ;;  %v4350_v31 = vrot.slane %v848_v38, %v5081_v34 }
 0x12e   : > { %5067 = vst [vmem:[#allocation27_spill] sm:$0xff] %v4260_v40 }
 0x12f   : > { %5080 = vst [vmem:[#allocation39_spill] sm:$0xff] %v4346_v15  ;;  %5082 = vst [vmem:[#allocation40_spill] sm:$0xff] %v4350_v31 }
 0x130   : > { %1540 = vmatpush1.bf16.msra.mxu0 %v4240_v23  ;;  %v4264_v23 = vld [vmem:[%s3951_s20 + $0x1a0] ss:$8 sps:$4 sm:$0xff]  }
 0x131   : > { %1541 = vmatprep.subr.bf16.mxu0 %v4244_v25  ;;  %5068 = vst [vmem:[#allocation28_spill] sm:$0xff] %v4264_v23  ;;  %v4268_v25 = vld [vmem:[%s3951_s20 + $0x1b4] ss:$8 sps:$4 sm:$0xff]  }
 0x132   : > { %5069 = vst [vmem:[#allocation29_spill] sm:$0xff] %v4268_v25 }
 0x134   : > { %1542 = vmatpush1.bf16.msra.mxu0 %v4248_v27  ;;  %v4272_v27 = vld [vmem:[%s3951_s20 + $0x1b0] ss:$8 sps:$4 sm:$0xff]  }
 0x135   : > { %1543 = vmatprep.subr.bf16.mxu0 %v4252_v19  ;;  %5070 = vst [vmem:[#allocation30_spill] sm:$0xff] %v4272_v27  ;;  %v4276_v19 = vld [vmem:[%s3951_s20 + $0x1c4] ss:$8 sps:$4 sm:$0xff]  }
 0x136   : > { %5071 = vst [vmem:[#allocation31_spill] sm:$0xff] %v4276_v19 }
 0x138   : > { %1544 = vmatpush1.bf16.msra.mxu0 %v4256_v18  ;;  %v4280_v18 = vld [vmem:[%s3951_s20 + $0x1c0] ss:$8 sps:$4 sm:$0xff]  }
 0x139   : > { %1545 = vmatprep.subr.bf16.mxu0 %v4260_v40  ;;  %5072 = vst [vmem:[#allocation32_spill] sm:$0xff] %v4280_v18  ;;  %v4284_v40 = vld [vmem:[%s3951_s20 + $0x1d4] ss:$8 sps:$4 sm:$0xff]  }
 0x13a   : > { %5073 = vst [vmem:[#allocation33_spill] sm:$0xff] %v4284_v40 }
 0x13c   : > { %1546 = vmatpush1.bf16.msra.mxu0 %v4264_v23  ;;  %v4288_v23 = vld [vmem:[%s3951_s20 + $0x1d0] ss:$8 sps:$4 sm:$0xff]  }
 0x13d   : > { %1547 = vmatprep.subr.bf16.mxu0 %v4268_v25  ;;  %5074 = vst [vmem:[#allocation34_spill] sm:$0xff] %v4288_v23  ;;  %v4292_v25 = vld [vmem:[%s3951_s20 + $0x1e4] ss:$8 sps:$4 sm:$0xff]  }
 0x13e   : > { %5075 = vst [vmem:[#allocation35_spill] sm:$0xff] %v4292_v25 }
 0x140   : > { %1548 = vmatpush1.bf16.msra.mxu0 %v4272_v27  ;;  %v4296_v27 = vld [vmem:[%s3951_s20 + $0x1e0] ss:$8 sps:$4 sm:$0xff]  }
 0x141   : > { %1549 = vmatprep.subr.bf16.mxu0 %v4276_v19  ;;  %5076 = vst [vmem:[#allocation36_spill] sm:$0xff] %v4296_v27  ;;  %v4300_v19 = vld [vmem:[%s3951_s20 + $0x1f4] ss:$8 sps:$4 sm:$0xff]  }
 0x142   : > { %5077 = vst [vmem:[#allocation37_spill] sm:$0xff] %v4300_v19 }
 0x144   : > { %1550 = vmatpush1.bf16.msra.mxu0 %v4280_v18  ;;  %v4304_v18 = vld [vmem:[%s3951_s20 + $0x1f0] ss:$8 sps:$4 sm:$0xff]  }
 0x145   : > { %1551 = vmatprep.subr.bf16.mxu0 %v4284_v40  ;;  %5078 = vst [vmem:[#allocation38_spill] sm:$0xff] %v4304_v18  ;;  %v4309_v40 = vld [vmem:[%s4109_s14 + $0x68] sm:$0xff]  }
 0x146   : > { %3215 = vmatprep.subr.bf16.mxu1 %v4309_v40 }
 0x148   : > { %1552 = vmatpush1.bf16.msra.mxu0 %v4288_v23  ;;  %v4312_v23 = vld [vmem:[%s4109_s14 + $0x28] sm:$0xff]  }
 0x149   : > { %1553 = vmatprep.subr.bf16.mxu0 %v4292_v25  ;;  %3216 = vmatpush3.bf16.msra.mxu1 %v4312_v23  ;;  %v4317_v25 = vld [vmem:[%s4109_s14 + $0x70] sm:$0xff]  }
 0x14a   : > { %3217 = vmatprep.subr.bf16.mxu1 %v4317_v25 }
 0x14c   : > { %1554 = vmatpush1.bf16.msra.mxu0 %v4296_v27  ;;  %v4320_v27 = vld [vmem:[%s4109_s14 + $0x30] sm:$0xff]  }
 0x14d   : > { %1555 = vmatprep.subr.bf16.mxu0 %v4300_v19  ;;  %3218 = vmatpush3.bf16.msra.mxu1 %v4320_v27  ;;  %v4325_v19 = vld [vmem:[%s4109_s14 + $0x78] sm:$0xff]  }
 0x14e   : > { %3219 = vmatprep.subr.bf16.mxu1 %v4325_v19 }
 0x150   : > { %1556 = vmatpush1.bf16.msra.mxu0 %v4304_v18  ;;  %v5009_v18 = vmov 0.0  }
 0x151   : > { %3342 = vmatprep.subr.bf16.mxu0 %v5009_v18 }
 0x153   : > { %1558 = vmatmul.mubr.bf16.vlgmr.msra.gmra.mrb[4].mxu0 %v1149_v28  ;;  %v4328_v28 = vld [vmem:[%s4109_s14 + $0x38] sm:$0xff]  }
 0x154   : > { %3220 = vmatpush3.bf16.msra.mxu1 %v4328_v28 }
 0x155   : > { %3322 = vmatprep.subr.bf16.mxu1 %v5009_v18 }
 0x226   : > { %v1559_v29 = vpop.f32.mrb[4].mxu0 }
 0x227   : > { %v3442_v20 = vadd.f32 %v1559_v29, %v4346_v15  ;;  %v1561_v32 = vpop.f32.mrb[5].mxu0 }
 0x228   : > { %v3443_v18 = vadd.f32 %v1561_v32, %v4350_v31  ;;  %v1563_v26 = vpop.f32.mrb[6].mxu0 }
 0x229   : > { %v1572_v16 = vmul.f32 0.01, %v3442_v20  ;;  %v3444_v14 = vadd.f32 %v1563_v26, %v4346_v15  ;;  %v1565_v0 = vpop.f32.mrb[7].mxu0  ;;  %vm1568_vm8 = vcmp.gt.f32.partialorder %v3442_v20, 0.0 }
 0x22a   : > { %v1573_v24 = vmul.f32 0.01, %v3443_v18  ;;  %v3445_v36 = vadd.f32 %v1565_v0, %v4350_v31  ;;  %vm1569_vm9 = vcmp.gt.f32.partialorder %v3443_v18, 0.0  ;;  %v4361_v0 = vld [vmem:[%s4337_s30 + $0x8] sm:$0xff]   ;;  %v5083_v31 = vmov 0.0  }
 0x22b   : > { %vm1570_vm10 = vcmp.gt.f32.partialorder %v3444_v14, 0.0  ;;  %v1574_v17 = vmul.f32 0.01, %v3444_v14  ;;  %v1576_v34 = vsel %vm1568_vm8, %v3442_v20, %v1572_v16  ;;  %v4387_v16 = vld [vmem:[%s4337_s30 + $0x30] sm:$0xff]   ;;  %v4392_v20 = vld [vmem:[%s4337_s30 + $0x38] sm:$0xff]   ;;  %3350 = vmatprep.mubr.msk.bf16.mxu0 %vm3825_vm12, %v5083_v31 }
 0x22c   : > { %vm1571_vm11 = vcmp.gt.f32.partialorder %v3445_v36, 0.0  ;;  %v1575_v29 = vmul.f32 0.01, %v3445_v36  ;;  %v1577_v22 = vsel %vm1569_vm9, %v3443_v18, %v1573_v24  ;;  %v4382_v24 = vld [vmem:[%s4337_s30 + $0x28] sm:$0xff]   ;;  %5088 = vst [vmem:[#allocation45_spill] sm:$0xff] %v4387_v16  ;;  %5089 = vst [vmem:[#allocation46_spill] sm:$0xff] %v4392_v20 }
 0x22d   : > { %v1578_v32 = vsel %vm1570_vm10, %v3444_v14, %v1574_v17  ;;  %v4366_v14 = vld [vmem:[%s4337_s30 + $0x10] sm:$0xff]   ;;  %5087 = vst [vmem:[#allocation44_spill] sm:$0xff] %v4382_v24  ;;  %v4407_v18 = vld [vmem:[%s4404_s16] sm:$0xff]  }
 0x22e   : > { %v1580_v38 = vpack.c.bf16 %v1578_v32, %v1576_v34  ;;  %v1579_v26 = vsel %vm1571_vm11, %v3445_v36, %v1575_v29  ;;  %5084 = vst [vmem:[#allocation41_spill] sm:$0xff] %v4366_v14  ;;  %5090 = vst [vmem:[#allocation47_spill] sm:$0xff] %v4407_v18  ;;  %v4410_v36 = vld [vmem:[%s4404_s16 + $0x8] sm:$0xff]   ;;  %3343 = vmatpush3.bf16.msra.mxu0 %v4407_v18  ;;  %v4423_v29 = vld [vmem:[%s4420_s21] ss:$0 sm:$0xff] }
 0x22f   : > { %v1581_v15 = vpack.c.bf16 %v1579_v26, %v1577_v22  ;;  %v4371_v22 = vld [vmem:[%s4337_s30 + $0x18] sm:$0xff]   ;;  %5091 = vst [vmem:[#allocation48_spill] sm:$0xff] %v4410_v36  ;;  %3344 = vmatprep.subr.bf16.mxu0 %v5083_v31 }
 0x230   : > { %5085 = vst [vmem:[#allocation42_spill] sm:$0xff] %v4371_v22 }
 0x231   : > { %1716 = vmatprep.mubr.bf16.mxu1 %v1581_v15  ;;  %v4376_v15 = vld [vmem:[%s4337_s30 + $0x20] sm:$0xff]  }
 0x232   : > { %1717 = vmatmul.mubr.bf16.vlgmr.msra.gmra.mrb[4].mxu1 %v1580_v38  ;;  %5086 = vst [vmem:[#allocation43_spill] sm:$0xff] %v4376_v15  ;;  %3345 = vmatpush3.bf16.msra.mxu0 %v4410_v36 }
 0x233   : > { %3323 = vmatpush3.bf16.msra.mxu1 %v4357_v21  ;;  %3338 = vmatprep.mubr.msk.bf16.mxu1 %vm3825_vm12, %v5083_v31 }
 0x234   : > { %3324 = vmatprep.subr.bf16.mxu1 %v5083_v31  ;;  %3346 = vmatprep.subr.bf16.mxu0 %v5083_v31 }
 0x237   : > { %3325 = vmatpush3.bf16.msra.mxu1 %v4361_v0 }
 0x238   : > { %3326 = vmatprep.subr.bf16.mxu1 %v5083_v31 }
 0x23b   : > { %3327 = vmatpush3.bf16.msra.mxu1 %v4366_v14 }
 0x23c   : > { %3328 = vmatprep.subr.bf16.mxu1 %v5083_v31 }
 0x23f   : > { %3329 = vmatpush3.bf16.msra.mxu1 %v4371_v22 }
 0x240   : > { %3330 = vmatprep.subr.bf16.mxu1 %v5083_v31 }
 0x243   : > { %3331 = vmatpush3.bf16.msra.mxu1 %v4376_v15 }
 0x244   : > { %3332 = vmatprep.subr.bf16.mxu1 %v5083_v31 }
 0x247   : > { %3333 = vmatpush3.bf16.msra.mxu1 %v4382_v24 }
 0x248   : > { %3334 = vmatprep.subr.bf16.mxu1 %v5083_v31 }
 0x24b   : > { %3335 = vmatpush3.bf16.msra.mxu1 %v4387_v16 }
 0x24c   : > { %3336 = vmatprep.subr.bf16.mxu1 %v5083_v31 }
 0x24f   : > { %3337 = vmatpush3.bf16.msra.mxu1 %v4392_v20 }
 0x250   : > { %3354 = vmatprep.subr.bf16.mxu1 %v5083_v31 }
 0x305   : > { %v3221_v17 = vpop.f32.mrb[4].mxu1 }
 0x306   : > { %v3222_v34 = vpop.f32.mrb[5].mxu1 }
 0x307   : > { %v3223_v32 = vadd.f32 %v3222_v34, %v3221_v17  ;;  %v3224_v38 = vpop.f32.mrb[6].mxu1  ;;  %v4430_v17 = vld [vmem:[%s4404_s16 + $0x10] sm:$0xff]   ;;  %v4435_v34 = vld [vmem:[%s4404_s16 + $0x18] sm:$0xff]  }
 0x308   : > { %v3225_v26 = vpop.f32.mrb[7].mxu1  ;;  %3347 = vmatpush3.bf16.msra.mxu0 %v4430_v17 }
 0x309   : > { %v1719_v18 = vadd.f32 %v3223_v32, %v4423_v29  ;;  %v3226_v36 = vadd.f32 %v3225_v26, %v3224_v38  ;;  %3348 = vmatprep.subr.bf16.mxu0 %v5083_v31 }
 0x30b   : > { %v1727_v20 = vmul.f32 0.01, %v1719_v18  ;;  %v1722_v16 = vadd.f32 %v3226_v36, %v4423_v29  ;;  %vm1725_vm13 = vcmp.gt.f32.partialorder %v1719_v18, 0.0 }
 0x30c   : > { %3349 = vmatpush3.bf16.msra.mxu0 %v4435_v34 }
 0x30d   : > { %vm1726_vm14 = vcmp.gt.f32.partialorder %v1722_v16, 0.0  ;;  %v1728_v24 = vmul.f32 0.01, %v1722_v16  ;;  %v1729_v15 = vsel %vm1725_vm13, %v1719_v18, %v1727_v20  ;;  %2102 = vmatprep.subr.bf16.mxu0 %v3969_v30 }
 0x30f   : > { %v1730_v22 = vsel %vm1726_vm14, %v1722_v16, %v1728_v24 }
 0x310   : > { %v1731_v14 = vpack.c.bf16 %v1730_v22, %v1729_v15 }
 0x312   : > { %3339 = vmatmul.mubr.bf16.vlgmr.msra.gmra.mrb[8].mxu1 %v1731_v14  ;;  %v4446_v14 = vld [vmem:[%s4443_s29] ss:$0 sm:$0xff] }
 0x313   : > { %3358 = vmatprep.mubr.msk.bf16.mxu1 %vm3825_vm12, %v5083_v31 }
 0x3e5   : > { %v1820_v22 = vpop.f32.mrb[8].mxu1 }
 0x3e6   : > { %v1821_v15 = vadd.f32 %v4446_v14, %v1820_v22  ;;  %v3340_v24 = vpop.f32.mrb[9].mxu1  ;;  %v4586_v22 = vld [vmem:[%s4583_s0] ss:$0 sm:$0xff] }
 0x3e7   : > { %v1823_v16 = vpop.f32.mrb[10].mxu1  ;;  %5093 = vst [vmem:[#allocation49_spill] sm:$0xff] %v4586_v22 }
 0x3e8   : > { %v1829_v20 = vmul.f32 0.01, %v1821_v15  ;;  %v1824_v18 = vadd.f32 %v4446_v14, %v1823_v16  ;;  %v3341_v36 = vpop.f32.mrb[11].mxu1  ;;  %vm1827_vm15 = vcmp.gt.f32.partialorder %v1821_v15, 0.0 }
 0x3ea   : > { %vm1828_vm0 = vcmp.gt.f32.partialorder %v1824_v18, 0.0  ;;  %v1830_v30 = vmul.f32 0.01, %v1824_v18  ;;  %v1831_v32 = vsel %vm1827_vm15, %v1821_v15, %v1829_v20 }
 0x3ec   : > { %v1832_v38 = vsel %vm1828_vm0, %v1824_v18, %v1830_v30 }
 0x3ed   : > { %v1833_v26 = vpack.c.bf16 %v1832_v38, %v1831_v32 }
 0x3ef   : > { %3351 = vmatmul.mubr.msk.bf16.vlgmr.msra.gmra.mrb[8].mxu0 %vm1864_vm1, %v1833_v26 }
 0x3f0   : > { %2103 = vmatpush1.bf16.msra.mxu0 %v3973_v33  ;;  %v4490_v33 = vld [vmem:[%s4487_s22] sm:$0xff]  }
 0x3f1   : > { %2104 = vmatprep.subr.bf16.mxu0 %v3978_v35  ;;  %3355 = vmatpush3.bf16.msra.mxu1 %v4490_v33  ;;  %v4495_v35 = vld [vmem:[%s4487_s22 + $0x8] sm:$0xff]  }
 0x3f2   : > { %3356 = vmatprep.subr.bf16.mxu1 %v5083_v31 }
 0x3f4   : > { %2105 = vmatpush1.bf16.msra.mxu0 %v3983_v37  ;;  %v4499_v37 = vld [vmem:[%s3922_s15 + $0x4] ss:$16 sps:$4 sm:$0xff]  }
 0x3f5   : > { %2106 = vmatprep.subr.bf16.mxu0 %v3988_v39  ;;  %3357 = vmatpush3.bf16.msra.mxu1 %v4495_v35  ;;  %v4509_v39 = vld [vmem:[%s4506_s19] ss:$0 sm:$0xff] }
 0x3f6   : > { %1988 = vmatprep.subr.bf16.mxu1 %v4499_v37 }
 0x3f8   : > { %2107 = vmatpush1.bf16.msra.mxu0 %v3993_v41 }
 0x3f9   : > { %2108 = vmatprep.subr.bf16.mxu0 %v3997_v42 }
 0x3fc   : > { %2109 = vmatpush1.bf16.msra.mxu0 %v4000_v43 }
 0x3fd   : > { %2110 = vmatprep.subr.bf16.mxu0 %v4003_v44 }
 0x400   : > { %2111 = vmatpush1.bf16.msra.mxu0 %v4008_v45 }
 0x401   : > { %2112 = vmatprep.subr.bf16.mxu0 %v4011_v46 }
 0x404   : > { %2113 = vmatpush1.bf16.msra.mxu0 %v4016_v47 }
 0x405   : > { %2114 = vmatprep.subr.bf16.mxu0 %v4019_v48 }
 0x408   : > { %2115 = vmatpush1.bf16.msra.mxu0 %v4025_v49 }
 0x409   : > { %2116 = vmatprep.subr.bf16.mxu0 %v4029_v50 }
 0x40c   : > { %2117 = vmatpush1.bf16.msra.mxu0 %v4033_v51 }
 0x40d   : > { %2118 = vmatprep.subr.bf16.mxu0 %v4037_v52  ;;  %v4515_v52 = vld [vmem:[%s3922_s15] ss:$16 sps:$4 sm:$0xff]  }
 0x410   : > { %2119 = vmatpush1.bf16.msra.mxu0 %v4041_v53  ;;  %v5092_v53 = vmov 0  }
 0x411   : > { %2120 = vmatprep.subr.bf16.mxu0 %v4045_v54  ;;  %v4520_v54 = vld [vmem:[%s3922_s15 + $0x24] ss:$16 sps:$4 sm:$0xff]  }
 0x414   : > { %2121 = vmatpush1.bf16.msra.mxu0 %v4049_v55  ;;  %v4524_v55 = vld [vmem:[%s3922_s15 + $0x20] ss:$16 sps:$4 sm:$0xff]  }
 0x415   : > { %2122 = vmatprep.subr.bf16.mxu0 %v4053_v56  ;;  %v4528_v56 = vld [vmem:[%s3922_s15 + $0x44] ss:$16 sps:$4 sm:$0xff]  }
 0x418   : > { %2123 = vmatpush1.bf16.msra.mxu0 %v4057_v57  ;;  %v4532_v57 = vld [vmem:[%s3922_s15 + $0x40] ss:$16 sps:$4 sm:$0xff]  }
 0x419   : > { %2124 = vmatprep.subr.bf16.mxu0 %v4061_v58  ;;  %v4536_v58 = vld [vmem:[%s3922_s15 + $0x64] ss:$16 sps:$4 sm:$0xff]  }
 0x41c   : > { %2125 = vmatpush1.bf16.msra.mxu0 %v4065_v59  ;;  %v4540_v59 = vld [vmem:[%s3922_s15 + $0x60] ss:$16 sps:$4 sm:$0xff]  }
 0x41d   : > { %2126 = vmatprep.subr.bf16.mxu0 %v4069_v60  ;;  %v4544_v60 = vld [vmem:[%s3922_s15 + $0x84] ss:$16 sps:$4 sm:$0xff]  }
 0x420   : > { %2127 = vmatpush1.bf16.msra.mxu0 %v4073_v61  ;;  %v4548_v61 = vld [vmem:[%s3922_s15 + $0x80] ss:$16 sps:$4 sm:$0xff]  }
 0x421   : > { %2128 = vmatprep.subr.bf16.mxu0 %v4077_v62  ;;  %v4552_v62 = vld [vmem:[%s3922_s15 + $0xa4] ss:$16 sps:$4 sm:$0xff]  }
 0x424   : > { %2129 = vmatpush1.bf16.msra.mxu0 %v4081_v63  ;;  %v4556_v63 = vld [vmem:[%s3922_s15 + $0xa0] ss:$16 sps:$4 sm:$0xff]  }
 0x425   : > { %2130 = vmatprep.subr.bf16.mxu0 %v4086_v1  ;;  %v4560_v1 = vld [vmem:[%s3922_s15 + $0xc4] ss:$16 sps:$4 sm:$0xff]  }
 0x428   : > { %2131 = vmatpush1.bf16.msra.mxu0 %v4089_v2  ;;  %v4564_v2 = vld [vmem:[%s3922_s15 + $0xc0] ss:$16 sps:$4 sm:$0xff]  }
 0x429   : > { %2132 = vmatprep.subr.bf16.mxu0 %v4094_v3  ;;  %v4568_v3 = vld [vmem:[%s3922_s15 + $0xe4] ss:$16 sps:$4 sm:$0xff]  }
 0x42c   : > { %2133 = vmatpush1.bf16.msra.mxu0 %v4097_v4  ;;  %v4572_v4 = vld [vmem:[%s3922_s15 + $0xe0] ss:$16 sps:$4 sm:$0xff]  }
 0x42d   : > { %2145 = vmatprep.subr.bf16.mxu0 %v4102_v5  ;;  %v4576_v5 = vld [vmem:[%s3922_s15 + $0xc] ss:$16 sps:$4 sm:$0xff]  }
 0x4c2   : > { %v1902_v41 = vpop.f32.mrb[8].mxu0 }
 0x4c3   : > { %v1903_v42 = vadd.f32 %v4509_v39, %v1902_v41  ;;  %v3352_v43 = vpop.f32.mrb[9].mxu0  ;;  %v4591_v41 = vld [vmem:[%s3958_s23] sm:$0xff] }
 0x4c4   : > { %v1905_v44 = vpop.f32.mrb[10].mxu0  ;;  %5094 = vst [vmem:[#allocation50_spill] sm:$0xff] %v4591_v41  ;;  %v4595_v43 = vld [vmem:[%s3958_s23 + $0x8] sm:$0xff] }
 0x4c5   : > { %v1911_v45 = vmul.f32 0.01, %v1903_v42  ;;  %v1906_v46 = vadd.f32 %v4509_v39, %v1905_v44  ;;  %v3353_v47 = vpop.f32.mrb[11].mxu0  ;;  %vm1909_vm2 = vcmp.gt.f32.partialorder %v1903_v42, 0.0  ;;  %5095 = vst [vmem:[#allocation51_spill] sm:$0xff] %v4595_v43 }
 0x4c6   : > { %v4604_v47 = vld [vmem:[%s3922_s15 + $0x2c] ss:$16 sps:$4 sm:$0xff]  }
 0x4c7   : > { %vm1910_vm3 = vcmp.gt.f32.partialorder %v1906_v46, 0.0  ;;  %v1912_v48 = vmul.f32 0.01, %v1906_v46  ;;  %v1913_v49 = vsel %vm1909_vm2, %v1903_v42, %v1911_v45 }
 0x4c9   : > { %v1914_v50 = vsel %vm1910_vm3, %v1906_v46, %v1912_v48  ;;  %v4599_v46 = vld [vmem:[%s3922_s15 + $0x8] ss:$16 sps:$4 sm:$0xff]  }
 0x4ca   : > { %v1915_v51 = vpack.c.bf16 %v1914_v50, %v1913_v49  ;;  %v4608_v48 = vld [vmem:[%s3922_s15 + $0x28] ss:$16 sps:$4 sm:$0xff]   ;;  %v4612_v49 = vld [vmem:[%s3922_s15 + $0x4c] ss:$16 sps:$4 sm:$0xff]  }
 0x4cb   : > { %v4616_v50 = vld [vmem:[%s3922_s15 + $0x48] ss:$16 sps:$4 sm:$0xff]  }
 0x4cc   : > { %3359 = vmatmul.mubr.msk.bf16.vlgmr.msra.gmra.mrb[12].mxu1 %vm1934_vm4, %v1915_v51  ;;  %v4620_v51 = vld [vmem:[%s3922_s15 + $0x6c] ss:$16 sps:$4 sm:$0xff]  }
 0x4cd   : > { %1989 = vmatpush1.bf16.msra.mxu1 %v4515_v52  ;;  %2020 = vmatprep.mubr.bf16.mxu1 %v5092_v53 }
 0x4ce   : > { %1990 = vmatprep.subr.bf16.mxu1 %v4520_v54 }
 0x4d1   : > { %1991 = vmatpush1.bf16.msra.mxu1 %v4524_v55 }
 0x4d2   : > { %1992 = vmatprep.subr.bf16.mxu1 %v4528_v56 }
 0x4d5   : > { %1993 = vmatpush1.bf16.msra.mxu1 %v4532_v57 }
 0x4d6   : > { %1994 = vmatprep.subr.bf16.mxu1 %v4536_v58 }
 0x4d9   : > { %1995 = vmatpush1.bf16.msra.mxu1 %v4540_v59 }
 0x4da   : > { %1996 = vmatprep.subr.bf16.mxu1 %v4544_v60 }
 0x4dd   : > { %1997 = vmatpush1.bf16.msra.mxu1 %v4548_v61 }
 0x4de   : > { %1998 = vmatprep.subr.bf16.mxu1 %v4552_v62 }
 0x4e1   : > { %1999 = vmatpush1.bf16.msra.mxu1 %v4556_v63 }
 0x4e2   : > { %2000 = vmatprep.subr.bf16.mxu1 %v4560_v1 }
 0x4e5   : > { %2001 = vmatpush1.bf16.msra.mxu1 %v4564_v2 }
 0x4e6   : > { %2002 = vmatprep.subr.bf16.mxu1 %v4568_v3 }
 0x4e9   : > { %2003 = vmatpush1.bf16.msra.mxu1 %v4572_v4 }
 0x4ea   : > { %2031 = vmatprep.subr.bf16.mxu1 %v4576_v5 }
 0x59f   : > { %v1972_v15 = vpop.f32.mrb[12].mxu1 }
 0x5a0   : > { %v1973_v24 = vadd.f32 %v4586_v22, %v1972_v15  ;;  %v3360_v16 = vpop.f32.mrb[13].mxu1  ;;  %v4624_v15 = vld [vmem:[%s3922_s15 + $0x68] ss:$16 sps:$4 sm:$0xff]  }
 0x5a1   : > { %v1975_v20 = vpop.f32.mrb[14].mxu1  ;;  %v4632_v16 = vld [vmem:[%s3922_s15 + $0x88] ss:$16 sps:$4 sm:$0xff]  }
 0x5a2   : > { %vm1979_vm5 = vcmp.gt.f32.partialorder %v1973_v24, 0.0  ;;  %v1981_v18 = vmul.f32 0.01, %v1973_v24  ;;  %v1976_v36 = vadd.f32 %v4586_v22, %v1975_v20  ;;  %v3361_v30 = vpop.f32.mrb[15].mxu1  ;;  %v4636_v20 = vld [vmem:[%s3922_s15 + $0xac] ss:$16 sps:$4 sm:$0xff]  }
 0x5a3   : > { %v4648_v30 = vld [vmem:[%s3922_s15 + $0xc8] ss:$16 sps:$4 sm:$0xff]  }
 0x5a4   : > { %v1983_v32 = vsel %vm1979_vm5, %v1973_v24, %v1981_v18  ;;  %vm1980_vm6 = vcmp.gt.f32.partialorder %v1976_v36, 0.0  ;;  %v1982_v38 = vmul.f32 0.01, %v1976_v36  ;;  %v4628_v24 = vld [vmem:[%s3922_s15 + $0x8c] ss:$16 sps:$4 sm:$0xff]  }
 0x5a5   : > { %v1985_v42 = vadd.f32 %v4591_v41, %v1983_v32  ;;  %v4640_v18 = vld [vmem:[%s3922_s15 + $0xa8] ss:$16 sps:$4 sm:$0xff]   ;;  %v4652_v32 = vld [vmem:[%s3922_s15 + $0xec] ss:$16 sps:$4 sm:$0xff]  }
 0x5a6   : > { %v1984_v26 = vsel %vm1980_vm6, %v1976_v36, %v1982_v38  ;;  %v4644_v36 = vld [vmem:[%s3922_s15 + $0xcc] ss:$16 sps:$4 sm:$0xff]   ;;  %v4656_v38 = vld [vmem:[%s3922_s15 + $0xe8] ss:$16 sps:$4 sm:$0xff]  }
 0x5a7   : > { %v1986_v44 = vadd.f32 %v4595_v43, %v1984_v26  ;;  %v5096_v26 = vld [vmem:[#allocation2_spill] sm:$0xff]  ;;  %v5105_v41 = vld [vmem:[#allocation13_spill] sm:$0xff]  ;;  %v5121_v22 = vld [vmem:[#allocation27_spill] sm:$0xff] }
 0x5a8   : > { %v5100_v43 = vld [vmem:[#allocation6_spill] sm:$0xff] }
 0x5a9   : > { %v1987_v45 = vpack.c.bf16 %v1986_v44, %v1985_v42  ;;  %v5097_v42 = vld [vmem:[#allocation3_spill] sm:$0xff] }
 0x5ab   : > { %2021 = vmatmul.mubr.bf16.vlgmr.msra.gmra.mrb[16].mxu1 %v1987_v45 }
 0x5ac   : > { %2032 = vmatpush1.bf16.msra.mxu1 %v4599_v46  ;;  %2063 = vmatprep.mubr.bf16.mxu1 %v5092_v53 }
 0x5ad   : > { %2033 = vmatprep.subr.bf16.mxu1 %v4604_v47 }
 0x5b0   : > { %2034 = vmatpush1.bf16.msra.mxu1 %v4608_v48 }
 0x5b1   : > { %2035 = vmatprep.subr.bf16.mxu1 %v4612_v49 }
 0x5b4   : > { %2036 = vmatpush1.bf16.msra.mxu1 %v4616_v50 }
 0x5b5   : > { %2037 = vmatprep.subr.bf16.mxu1 %v4620_v51 }
 0x5b8   : > { %2038 = vmatpush1.bf16.msra.mxu1 %v4624_v15 }
 0x5b9   : > { %2039 = vmatprep.subr.bf16.mxu1 %v4628_v24 }
 0x5bc   : > { %2040 = vmatpush1.bf16.msra.mxu1 %v4632_v16 }
 0x5bd   : > { %2041 = vmatprep.subr.bf16.mxu1 %v4636_v20 }
 0x5c0   : > { %2042 = vmatpush1.bf16.msra.mxu1 %v4640_v18 }
 0x5c1   : > { %2043 = vmatprep.subr.bf16.mxu1 %v4644_v36 }
 0x5c4   : > { %2044 = vmatpush1.bf16.msra.mxu1 %v4648_v30 }
 0x5c5   : > { %2045 = vmatprep.subr.bf16.mxu1 %v4652_v32 }
 0x5c8   : > { %2046 = vmatpush1.bf16.msra.mxu1 %v4656_v38 }
 0x5c9   : > { %3244 = vmatprep.subr.bf16.mxu1 %v4112_v6 }
 0x5cb   : > { %2064 = vmatmul.mubr.bf16.vlgmr.msra.gmra.mrb[20].mxu1 %v1987_v45 }
 0x5cc   : > { %3245 = vmatpush3.bf16.msra.mxu1 %v4115_v7  ;;  %v5098_v7 = vld [vmem:[#allocation4_spill] sm:$0xff] }
 0x5cd   : > { %3246 = vmatprep.subr.bf16.mxu1 %v4119_v8 }
 0x5d0   : > { %3247 = vmatpush3.bf16.msra.mxu1 %v4123_v9 }
 0x5d1   : > { %3248 = vmatprep.subr.bf16.mxu1 %v4127_v10  ;;  %v5099_v10 = vld [vmem:[#allocation5_spill] sm:$0xff] }
 0x5d4   : > { %3249 = vmatpush3.bf16.msra.mxu1 %v4131_v11 }
 0x5d5   : > { %3250 = vmatprep.subr.bf16.mxu1 %v4135_v12 }
 0x5d8   : > { %3251 = vmatpush3.bf16.msra.mxu1 %v4138_v13 }
 0x5d9   : > { %3252 = vmatprep.subr.bf16.mxu1 %v5096_v26 }
 0x5dc   : > { %3253 = vmatpush3.bf16.msra.mxu1 %v5097_v42 }
 0x5dd   : > { %3254 = vmatprep.subr.bf16.mxu1 %v4309_v40 }
 0x5e0   : > { %3255 = vmatpush3.bf16.msra.mxu1 %v4312_v23 }
 0x5e1   : > { %3256 = vmatprep.subr.bf16.mxu1 %v4317_v25 }
 0x5e4   : > { %3257 = vmatpush3.bf16.msra.mxu1 %v4320_v27 }
 0x5e5   : > { %3258 = vmatprep.subr.bf16.mxu1 %v4325_v19 }
 0x5e8   : > { %3259 = vmatpush3.bf16.msra.mxu1 %v4328_v28 }
 0x5e9   : > { %3362 = vmatprep.subr.bf16.mxu1 %v5083_v31 }
 0x67e   : > { %v2022_v6 = vpop.f32.mrb[16].mxu1 }
 0x67f   : > { %v2023_v8 = vadd.f32 %v2022_v6, %v5098_v7  ;;  %v2024_v9 = vpop.f32.mrb[17].mxu1 }
 0x680   : > { %v2025_v11 = vadd.f32 %v2024_v9, %v5099_v10  ;;  %v2026_v12 = vpop.f32.mrb[18].mxu1 }
 0x681   : > { %v2082_v13 = vmul.f32 0.01, %v2023_v8  ;;  %v2027_v40 = vadd.f32 %v2026_v12, %v5098_v7  ;;  %v2028_v23 = vpop.f32.mrb[19].mxu1  ;;  %vm2074_vm7 = vcmp.gt.f32.partialorder %v2023_v8, 0.0  ;;  %v5101_v12 = vld [vmem:[#allocation8_spill] sm:$0xff]  ;;  %v5102_v7 = vld [vmem:[#allocation10_spill] sm:$0xff] }
 0x682   : > { %v2083_v25 = vmul.f32 0.01, %v2025_v11  ;;  %v2029_v27 = vadd.f32 %v2028_v23, %v5099_v10  ;;  %vm2075_vm8 = vcmp.gt.f32.partialorder %v2025_v11, 0.0  ;;  %v5103_v23 = vld [vmem:[#allocation11_spill] sm:$0xff]  ;;  %v5104_v10 = vld [vmem:[#allocation12_spill] sm:$0xff] }
 0x683   : > { %vm2078_vm9 = vcmp.gt.f32.partialorder %v2027_v40, 0.0  ;;  %v2086_v19 = vmul.f32 0.01, %v2027_v40  ;;  %v2090_v44 = vsel %vm2074_vm7, %v2023_v8, %v2082_v13  ;;  %v5106_v8 = vld [vmem:[#allocation14_spill] sm:$0xff]  ;;  %v5107_v13 = vld [vmem:[#allocation15_spill] sm:$0xff] }
 0x684   : > { %vm2079_vm10 = vcmp.gt.f32.partialorder %v2029_v27, 0.0  ;;  %v2087_v28 = vmul.f32 0.01, %v2029_v27  ;;  %v2091_v42 = vsel %vm2075_vm8, %v2025_v11, %v2083_v25  ;;  %v5108_v11 = vld [vmem:[#allocation16_spill] sm:$0xff] }
 0x685   : > { %v2094_v45 = vsel %vm2078_vm9, %v2027_v40, %v2086_v19  ;;  %v5109_v40 = vld [vmem:[#allocation17_spill] sm:$0xff] }
 0x686   : > { %v2098_v26 = vpack.c.bf16 %v2094_v45, %v2090_v44  ;;  %v2095_v6 = vsel %vm2079_vm10, %v2029_v27, %v2087_v28  ;;  %v5111_v28 = vld [vmem:[#allocation18_spill] sm:$0xff] }
 0x687   : > { %v2099_v9 = vpack.c.bf16 %v2095_v6, %v2091_v42 }
 0x689   : > { %2134 = vmatprep.mubr.bf16.mxu0 %v2099_v9 }
 0x68a   : > { %2135 = vmatmul.mubr.bf16.vlgmr.msra.gmra.mrb[12].mxu0 %v2098_v26 }
 0x68b   : > { %2146 = vmatpush1.bf16.msra.mxu0 %v5100_v43  ;;  %v5110_v43 = vld [vmem:[#allocation7_spill] sm:$0xff] }
 0x68c   : > { %2147 = vmatprep.subr.bf16.mxu0 %v5101_v12 }
 0x68f   : > { %2148 = vmatpush1.bf16.msra.mxu0 %v5102_v7  ;;  %v5112_v7 = vld [vmem:[#allocation9_spill] sm:$0xff] }
 0x690   : > { %2149 = vmatprep.subr.bf16.mxu0 %v5103_v23  ;;  %v5114_v23 = vld [vmem:[#allocation20_spill] sm:$0xff] }
 0x693   : > { %2150 = vmatpush1.bf16.msra.mxu0 %v5104_v10  ;;  %v5113_v10 = vld [vmem:[#allocation19_spill] sm:$0xff] }
 0x694   : > { %2151 = vmatprep.subr.bf16.mxu0 %v5105_v41 }
 0x697   : > { %2152 = vmatpush1.bf16.msra.mxu0 %v5106_v8 }
 0x698   : > { %2153 = vmatprep.subr.bf16.mxu0 %v5107_v13  ;;  %v5115_v13 = vld [vmem:[#allocation21_spill] sm:$0xff] }
 0x69b   : > { %2154 = vmatpush1.bf16.msra.mxu0 %v5108_v11 }
 0x69c   : > { %2155 = vmatprep.subr.bf16.mxu0 %v5109_v40 }
 0x69e   : > { %v2065_v25 = vpop.f32.mrb[20].mxu1 }
 0x69f   : > { %v2066_v27 = vadd.f32 %v2065_v25, %v5110_v43  ;;  %v2067_v19 = vpop.f32.mrb[21].mxu1  ;;  %2156 = vmatpush1.bf16.msra.mxu0 %v5111_v28 }
 0x6a0   : > { %v2068_v44 = vadd.f32 %v2067_v19, %v5112_v7  ;;  %v2069_v45 = vpop.f32.mrb[22].mxu1  ;;  %2157 = vmatprep.subr.bf16.mxu0 %v5113_v10 }
 0x6a1   : > { %v2084_v41 = vmul.f32 0.01, %v2066_v27  ;;  %v2070_v26 = vadd.f32 %v2069_v45, %v5110_v43  ;;  %v2071_v42 = vpop.f32.mrb[23].mxu1  ;;  %vm2076_vm11 = vcmp.gt.f32.partialorder %v2066_v27, 0.0  ;;  %v5116_v45 = vld [vmem:[#allocation22_spill] sm:$0xff]  ;;  %v5117_v43 = vld [vmem:[#allocation23_spill] sm:$0xff] }
 0x6a2   : > { %v2085_v6 = vmul.f32 0.01, %v2068_v44  ;;  %v2072_v9 = vadd.f32 %v2071_v42, %v5112_v7  ;;  %vm2077_vm13 = vcmp.gt.f32.partialorder %v2068_v44, 0.0  ;;  %v5118_v42 = vld [vmem:[#allocation24_spill] sm:$0xff]  ;;  %v5119_v7 = vld [vmem:[#allocation25_spill] sm:$0xff] }
 0x6a3   : > { %vm2080_vm14 = vcmp.gt.f32.partialorder %v2070_v26, 0.0  ;;  %v2088_v12 = vmul.f32 0.01, %v2070_v26  ;;  %2158 = vmatpush1.bf16.msra.mxu0 %v5114_v23  ;;  %v2092_v11 = vsel %vm2076_vm11, %v2066_v27, %v2084_v41  ;;  %v5120_v23 = vld [vmem:[#allocation26_spill] sm:$0xff]  ;;  %v5123_v27 = vld [vmem:[#allocation29_spill] sm:$0xff]  ;;  %v5125_v41 = vld [vmem:[#allocation31_spill] sm:$0xff] }
 0x6a4   : > { %vm2081_vm15 = vcmp.gt.f32.partialorder %v2072_v9, 0.0  ;;  %v2089_v8 = vmul.f32 0.01, %v2072_v9  ;;  %2159 = vmatprep.subr.bf16.mxu0 %v5115_v13  ;;  %v2093_v19 = vsel %vm2077_vm13, %v2068_v44, %v2085_v6  ;;  %v5122_v13 = vld [vmem:[#allocation28_spill] sm:$0xff]  ;;  %v5124_v44 = vld [vmem:[#allocation30_spill] sm:$0xff] }
 0x6a5   : > { %v2096_v40 = vsel %vm2080_vm14, %v2070_v26, %v2088_v12  ;;  %v5126_v26 = vld [vmem:[#allocation32_spill] sm:$0xff]  ;;  %v5128_v6 = vld [vmem:[#allocation34_spill] sm:$0xff]  ;;  %v5131_v12 = vld [vmem:[#allocation37_spill] sm:$0xff] }
 0x6a6   : > { %v2100_v25 = vpack.c.bf16 %v2096_v40, %v2092_v11  ;;  %v2097_v28 = vsel %vm2081_vm15, %v2072_v9, %v2089_v8  ;;  %v5129_v9 = vld [vmem:[#allocation35_spill] sm:$0xff] }
 0x6a7   : > { %2160 = vmatpush1.bf16.msra.mxu0 %v5116_v45  ;;  %v2101_v10 = vpack.c.bf16 %v2097_v28, %v2093_v19  ;;  %v5135_v28 = vld [vmem:[#allocation41_spill] sm:$0xff]  ;;  %v5136_v45 = vld [vmem:[#allocation42_spill] sm:$0xff] }
 0x6a8   : > { %2161 = vmatprep.subr.bf16.mxu0 %v5117_v43  ;;  %v5127_v43 = vld [vmem:[#allocation33_spill] sm:$0xff] }
 0x6a9   : > { %2177 = vmatprep.mubr.bf16.mxu0 %v2101_v10  ;;  %v5137_v10 = vld [vmem:[#allocation43_spill] sm:$0xff] }
 0x6ab   : > { %2162 = vmatpush1.bf16.msra.mxu0 %v5118_v42  ;;  %v5139_v42 = vld [vmem:[#allocation45_spill] sm:$0xff] }
 0x6ac   : > { %2163 = vmatprep.subr.bf16.mxu0 %v5119_v7  ;;  %v5130_v7 = vld [vmem:[#allocation36_spill] sm:$0xff] }
 0x6af   : > { %2164 = vmatpush1.bf16.msra.mxu0 %v5120_v23 }
 0x6b0   : > { %2165 = vmatprep.subr.bf16.mxu0 %v5121_v22  ;;  %v5132_v22 = vld [vmem:[#allocation38_spill] sm:$0xff] }
 0x6b3   : > { %2166 = vmatpush1.bf16.msra.mxu0 %v5122_v13 }
 0x6b4   : > { %2167 = vmatprep.subr.bf16.mxu0 %v5123_v27 }
 0x6b7   : > { %2168 = vmatpush1.bf16.msra.mxu0 %v5124_v44 }
 0x6b8   : > { %2169 = vmatprep.subr.bf16.mxu0 %v5125_v41 }
 0x6bb   : > { %2170 = vmatpush1.bf16.msra.mxu0 %v5126_v26 }
 0x6bc   : > { %2171 = vmatprep.subr.bf16.mxu0 %v5127_v43 }
 0x6bf   : > { %2172 = vmatpush1.bf16.msra.mxu0 %v5128_v6 }
 0x6c0   : > { %2173 = vmatprep.subr.bf16.mxu0 %v5129_v9 }
 0x6c3   : > { %2174 = vmatpush1.bf16.msra.mxu0 %v5130_v7 }
 0x6c4   : > { %2175 = vmatprep.subr.bf16.mxu0 %v5131_v12 }
 0x6c7   : > { %2176 = vmatpush1.bf16.msra.mxu0 %v5132_v22 }
 0x6c8   : > { %2445 = vmatprep.subr.bf16.mxu0 %v4576_v5  ;;  %v3701_v5 = vld [vmem:[%s4109_s14 + $0x40] sm:$0xff]  }
 0x6ca   : > { %2178 = vmatmul.mubr.bf16.vlgmr.msra.gmra.mrb[12].mxu0 %v2100_v25 }
 0x6cb   : > { %2446 = vmatpush1.bf16.msra.mxu0 %v4599_v46  ;;  %2477 = vmatprep.mubr.bf16.mxu0 %v5092_v53 }
 0x6cc   : > { %2447 = vmatprep.subr.bf16.mxu0 %v4604_v47  ;;  %v5133_v47 = vld [vmem:[#allocation39_spill] sm:$0xff] }
 0x6cf   : > { %2448 = vmatpush1.bf16.msra.mxu0 %v4608_v48 }
 0x6d0   : > { %2449 = vmatprep.subr.bf16.mxu0 %v4612_v49 }
 0x6d3   : > { %2450 = vmatpush1.bf16.msra.mxu0 %v4616_v50  ;;  %v5134_v50 = vld [vmem:[#allocation40_spill] sm:$0xff] }
 0x6d4   : > { %2451 = vmatprep.subr.bf16.mxu0 %v4620_v51 }
 0x6d7   : > { %2452 = vmatpush1.bf16.msra.mxu0 %v4624_v15 }
 0x6d8   : > { %2453 = vmatprep.subr.bf16.mxu0 %v4628_v24 }
 0x6db   : > { %2454 = vmatpush1.bf16.msra.mxu0 %v4632_v16 }
 0x6dc   : > { %2455 = vmatprep.subr.bf16.mxu0 %v4636_v20 }
 0x6df   : > { %2456 = vmatpush1.bf16.msra.mxu0 %v4640_v18 }
 0x6e0   : > { %2457 = vmatprep.subr.bf16.mxu0 %v4644_v36 }
 0x6e3   : > { %2458 = vmatpush1.bf16.msra.mxu0 %v4648_v30 }
 0x6e4   : > { %2459 = vmatprep.subr.bf16.mxu0 %v4652_v32 }
 0x6e7   : > { %2460 = vmatpush1.bf16.msra.mxu0 %v4656_v38 }
 0x6e8   : > { %3283 = vmatprep.subr.bf16.mxu0 %v3701_v5 }
 0x79d   : > { %v2179_v46 = vpop.f32.mrb[12].mxu0 }
 0x79e   : > { %v3446_v48 = vadd.f32 %v2179_v46, %v5133_v47  ;;  %v2181_v49 = vpop.f32.mrb[13].mxu0  ;;  %v5141_v46 = vld [vmem:[#allocation47_spill] sm:$0xff] }
 0x79f   : > { %v3447_v51 = vadd.f32 %v2181_v49, %v5134_v50  ;;  %v2183_v15 = vpop.f32.mrb[14].mxu0 }
 0x7a0   : > { %v2192_v24 = vmul.f32 0.01, %v3446_v48  ;;  %v3448_v16 = vadd.f32 %v2183_v15, %v5133_v47  ;;  %v2185_v20 = vpop.f32.mrb[15].mxu0  ;;  %vm2188_vm0 = vcmp.gt.f32.partialorder %v3446_v48, 0.0 }
 0x7a1   : > { %v2193_v18 = vmul.f32 0.01, %v3447_v51  ;;  %v3449_v36 = vadd.f32 %v2185_v20, %v5134_v50  ;;  %vm2189_vm2 = vcmp.gt.f32.partialorder %v3447_v51, 0.0 }
 0x7a2   : > { %vm2190_vm3 = vcmp.gt.f32.partialorder %v3448_v16, 0.0  ;;  %v2194_v30 = vmul.f32 0.01, %v3448_v16  ;;  %v2196_v38 = vsel %vm2188_vm0, %v3446_v48, %v2192_v24  ;;  %v5142_v48 = vld [vmem:[#allocation48_spill] sm:$0xff] }
 0x7a3   : > { %vm2191_vm5 = vcmp.gt.f32.partialorder %v3449_v36, 0.0  ;;  %v2195_v32 = vmul.f32 0.01, %v3449_v36  ;;  %v2197_v40 = vsel %vm2189_vm2, %v3447_v51, %v2193_v18 }
 0x7a4   : > { %v2198_v8 = vsel %vm2190_vm3, %v3448_v16, %v2194_v30 }
 0x7a5   : > { %v2200_v11 = vpack.c.bf16 %v2198_v8, %v2196_v38  ;;  %v2199_v25 = vsel %vm2191_vm5, %v3449_v36, %v2195_v32 }
 0x7a6   : > { %v2201_v19 = vpack.c.bf16 %v2199_v25, %v2197_v40 }
 0x7a8   : > { %2234 = vmatprep.mubr.bf16.mxu1 %v2201_v19 }
 0x7a9   : > { %2235 = vmatmul.mubr.bf16.vlgmr.msra.gmra.mrb[24].mxu1 %v2200_v11 }
 0x7aa   : > { %3363 = vmatpush3.bf16.msra.mxu1 %v4357_v21  ;;  %3378 = vmatprep.mubr.msk.bf16.mxu1 %vm3825_vm12, %v5083_v31  ;;  %v5138_v21 = vld [vmem:[#allocation44_spill] sm:$0xff] }
 0x7ab   : > { %3364 = vmatprep.subr.bf16.mxu1 %v5083_v31 }
 0x7ae   : > { %3365 = vmatpush3.bf16.msra.mxu1 %v4361_v0  ;;  %v5140_v0 = vld [vmem:[#allocation46_spill] sm:$0xff] }
 0x7af   : > { %3366 = vmatprep.subr.bf16.mxu1 %v5083_v31 }
 0x7b2   : > { %3367 = vmatpush3.bf16.msra.mxu1 %v5135_v28 }
 0x7b3   : > { %3368 = vmatprep.subr.bf16.mxu1 %v5083_v31 }
 0x7b6   : > { %3369 = vmatpush3.bf16.msra.mxu1 %v5136_v45  ;;  %v3705_v45 = vld [vmem:[%s3951_s20 + $0x14] ss:$8 sps:$4 sm:$0xff]  }
 0x7b7   : > { %3370 = vmatprep.subr.bf16.mxu1 %v5083_v31 }
 0x7ba   : > { %3371 = vmatpush3.bf16.msra.mxu1 %v5137_v10  ;;  %v3706_v10 = vld [vmem:[%s4109_s14 + $0x48] sm:$0xff]  }
 0x7bb   : > { %3372 = vmatprep.subr.bf16.mxu1 %v5083_v31 }
 0x7be   : > { %3373 = vmatpush3.bf16.msra.mxu1 %v5138_v21  ;;  %v3707_v21 = vld [vmem:[%s3951_s20 + $0x10] ss:$8 sps:$4 sm:$0xff]  }
 0x7bf   : > { %3374 = vmatprep.subr.bf16.mxu1 %v5083_v31 }
 0x7c2   : > { %3375 = vmatpush3.bf16.msra.mxu1 %v5139_v42  ;;  %v3708_v42 = vld [vmem:[%s4109_s14 + $0x8] sm:$0xff]  }
 0x7c3   : > { %3376 = vmatprep.subr.bf16.mxu1 %v5083_v31 }
 0x7c6   : > { %3377 = vmatpush3.bf16.msra.mxu1 %v5140_v0  ;;  %v3709_v0 = vld [vmem:[%s3951_s20 + $0x24] ss:$8 sps:$4 sm:$0xff]  }
 0x7c7   : > { %3382 = vmatprep.subr.bf16.mxu1 %v5083_v31 }
 0x87c   : > { %v3260_v23 = vpop.f32.mrb[24].mxu1 }
 0x87d   : > { %v3261_v13 = vpop.f32.mrb[25].mxu1 }
 0x87e   : > { %v3262_v27 = vadd.f32 %v3261_v13, %v3260_v23  ;;  %v3263_v44 = vpop.f32.mrb[26].mxu1  ;;  %v3710_v23 = vld [vmem:[%s4109_s14 + $0x50] sm:$0xff]   ;;  %v3711_v13 = vld [vmem:[%s3951_s20 + $0x20] ss:$8 sps:$4 sm:$0xff]  }
 0x87f   : > { %v3264_v41 = vpop.f32.mrb[27].mxu1 }
 0x880   : > { %v2237_v26 = vadd.f32 %v3262_v27, %v4423_v29  ;;  %v3265_v43 = vadd.f32 %v3264_v41, %v3263_v44  ;;  %v3712_v27 = vld [vmem:[%s4109_s14 + $0x10] sm:$0xff]   ;;  %v3714_v41 = vld [vmem:[%s4109_s14 + $0x58] sm:$0xff]  }
 0x881   : > { %v3713_v44 = vld [vmem:[%s3951_s20 + $0x34] ss:$8 sps:$4 sm:$0xff]  }
 0x882   : > { %v2245_v6 = vmul.f32 0.01, %v2237_v26  ;;  %v2240_v9 = vadd.f32 %v3265_v43, %v4423_v29  ;;  %vm2243_vm6 = vcmp.gt.f32.partialorder %v2237_v26, 0.0  ;;  %v3716_v43 = vld [vmem:[%s4109_s14 + $0x18] sm:$0xff]  }
 0x884   : > { %vm2244_vm7 = vcmp.gt.f32.partialorder %v2240_v9, 0.0  ;;  %v2246_v7 = vmul.f32 0.01, %v2240_v9  ;;  %v2247_v12 = vsel %vm2243_vm6, %v2237_v26, %v2245_v6  ;;  %v3715_v26 = vld [vmem:[%s3951_s20 + $0x30] ss:$8 sps:$4 sm:$0xff]  }
 0x885   : > { %v3717_v6 = vld [vmem:[%s3951_s20 + $0x44] ss:$8 sps:$4 sm:$0xff]  }
 0x886   : > { %v2248_v22 = vsel %vm2244_vm7, %v2240_v9, %v2246_v7  ;;  %v3718_v9 = vld [vmem:[%s4109_s14 + $0x60] sm:$0xff]  }
 0x887   : > { %v2249_v5 = vpack.c.bf16 %v2248_v22, %v2247_v12  ;;  %v3719_v7 = vld [vmem:[%s3951_s20 + $0x40] ss:$8 sps:$4 sm:$0xff]   ;;  %v3721_v22 = vld [vmem:[%s3951_s20 + $0x54] ss:$8 sps:$4 sm:$0xff]  }
 0x888   : > { %v3720_v12 = vld [vmem:[%s4109_s14 + $0x20] sm:$0xff]  }
 0x889   : > { %3379 = vmatmul.mubr.bf16.vlgmr.msra.gmra.mrb[28].mxu1 %v2249_v5  ;;  %v3722_v5 = vld [vmem:[%s4109_s14 + $0x68] sm:$0xff]  }
 0x88a   : > { %3383 = vmatpush3.bf16.msra.mxu1 %v5141_v46  ;;  %3390 = vmatprep.mubr.msk.bf16.mxu1 %vm3825_vm12, %v5083_v31  ;;  %v3723_v46 = vld [vmem:[%s3951_s20 + $0x50] ss:$8 sps:$4 sm:$0xff]  }
 0x88b   : > { %3384 = vmatprep.subr.bf16.mxu1 %v5083_v31 }
 0x88e   : > { %3385 = vmatpush3.bf16.msra.mxu1 %v5142_v48  ;;  %v3724_v48 = vld [vmem:[%s4109_s14 + $0x28] sm:$0xff]  }
 0x88f   : > { %3386 = vmatprep.subr.bf16.mxu1 %v5083_v31 }
 0x892   : > { %3387 = vmatpush3.bf16.msra.mxu1 %v4430_v17 }
 0x893   : > { %3388 = vmatprep.subr.bf16.mxu1 %v5083_v31 }
 0x896   : > { %3389 = vmatpush3.bf16.msra.mxu1 %v4435_v34 }
 0x897   : > { %3394 = vmatprep.subr.bf16.mxu1 %v5083_v31 }
 0x95c   : > { %v2284_v29 = vpop.f32.mrb[28].mxu1 }
 0x95d   : > { %v2285_v49 = vadd.f32 %v4446_v14, %v2284_v29  ;;  %v3380_v51 = vpop.f32.mrb[29].mxu1  ;;  %v3725_v29 = vld [vmem:[%s3951_s20 + $0x64] ss:$8 sps:$4 sm:$0xff]  }
 0x95e   : > { %v2287_v15 = vpop.f32.mrb[30].mxu1  ;;  %v3727_v51 = vld [vmem:[%s3951_s20 + $0x60] ss:$8 sps:$4 sm:$0xff]  }
 0x95f   : > { %v2293_v24 = vmul.f32 0.01, %v2285_v49  ;;  %v2288_v16 = vadd.f32 %v4446_v14, %v2287_v15  ;;  %v3381_v20 = vpop.f32.mrb[31].mxu1  ;;  %vm2291_vm8 = vcmp.gt.f32.partialorder %v2285_v49, 0.0  ;;  %v3728_v15 = vld [vmem:[%s4109_s14 + $0x30] sm:$0xff]  }
 0x960   : > { %v3731_v20 = vld [vmem:[%s3951_s20 + $0x70] ss:$8 sps:$4 sm:$0xff]  }
 0x961   : > { %vm2292_vm9 = vcmp.gt.f32.partialorder %v2288_v16, 0.0  ;;  %v2294_v18 = vmul.f32 0.01, %v2288_v16  ;;  %v2295_v36 = vsel %vm2291_vm8, %v2285_v49, %v2293_v24  ;;  %v3726_v49 = vld [vmem:[%s4109_s14 + $0x70] sm:$0xff]  }
 0x962   : > { %v3729_v24 = vld [vmem:[%s3951_s20 + $0x74] ss:$8 sps:$4 sm:$0xff]  }
 0x963   : > { %v2296_v17 = vsel %vm2292_vm9, %v2288_v16, %v2294_v18  ;;  %v3730_v16 = vld [vmem:[%s4109_s14 + $0x78] sm:$0xff]  }
 0x964   : > { %v2297_v30 = vpack.c.bf16 %v2296_v17, %v2295_v36  ;;  %v3732_v18 = vld [vmem:[%s4109_s14 + $0x38] sm:$0xff]   ;;  %v3733_v36 = vld [vmem:[%s3951_s20 + $0x84] ss:$8 sps:$4 sm:$0xff]   ;;  %v3734_v17 = vld [vmem:[%s3951_s20 + $0x80] ss:$8 sps:$4 sm:$0xff]  }
 0x966   : > { %3391 = vmatmul.mubr.msk.bf16.vlgmr.msra.gmra.mrb[32].mxu1 %vm1864_vm1, %v2297_v30  ;;  %v3735_v30 = vld [vmem:[%s3951_s20 + $0x94] ss:$8 sps:$4 sm:$0xff]  }
 0x967   : > { %3395 = vmatpush3.bf16.msra.mxu1 %v4490_v33  ;;  %3398 = vmatprep.mubr.msk.bf16.mxu1 %vm3825_vm12, %v5083_v31 }
 0x968   : > { %3396 = vmatprep.subr.bf16.mxu1 %v5083_v31 }
 0x96b   : > { %3397 = vmatpush3.bf16.msra.mxu1 %v4495_v35  ;;  %v3702_v35 = vld [vmem:[%s3951_s20 + $0x4] ss:$8 sps:$4 sm:$0xff]  }
 0x96c   : > { %2402 = vmatprep.subr.bf16.mxu1 %v4499_v37 }
 0xa39   : > { %v2335_v34 = vpop.f32.mrb[32].mxu1 }
 0xa3a   : > { %v2336_v14 = vadd.f32 %v4509_v39, %v2335_v34  ;;  %v3392_v32 = vpop.f32.mrb[33].mxu1  ;;  %v3736_v34 = vld [vmem:[%s3951_s20 + $0x90] ss:$8 sps:$4 sm:$0xff]  }
 0xa3b   : > { %v2338_v38 = vpop.f32.mrb[34].mxu1  ;;  %v3738_v32 = vld [vmem:[%s3951_s20 + $0xa0] ss:$8 sps:$4 sm:$0xff]  }
 0xa3c   : > { %v2344_v8 = vmul.f32 0.01, %v2336_v14  ;;  %v2339_v11 = vadd.f32 %v4509_v39, %v2338_v38  ;;  %v3393_v40 = vpop.f32.mrb[35].mxu1  ;;  %vm2342_vm10 = vcmp.gt.f32.partialorder %v2336_v14, 0.0  ;;  %v5143_v39 = vld [vmem:[#allocation49_spill] sm:$0xff] }
 0xa3d   : > { %v3739_v38 = vld [vmem:[%s3951_s20 + $0xb4] ss:$8 sps:$4 sm:$0xff]   ;;  %v3742_v40 = vld [vmem:[%s3951_s20 + $0xc0] ss:$8 sps:$4 sm:$0xff]  }
 0xa3e   : > { %vm2343_vm11 = vcmp.gt.f32.partialorder %v2339_v11, 0.0  ;;  %v2345_v33 = vmul.f32 0.01, %v2339_v11  ;;  %v2346_v25 = vsel %vm2342_vm10, %v2336_v14, %v2344_v8  ;;  %v3737_v14 = vld [vmem:[%s3951_s20 + $0xa4] ss:$8 sps:$4 sm:$0xff]  }
 0xa3f   : > { %v3740_v8 = vld [vmem:[%s3951_s20 + $0xb0] ss:$8 sps:$4 sm:$0xff]  }
 0xa40   : > { %v2347_v19 = vsel %vm2343_vm11, %v2339_v11, %v2345_v33  ;;  %v3741_v11 = vld [vmem:[%s3951_s20 + $0xc4] ss:$8 sps:$4 sm:$0xff]   ;;  %v3743_v33 = vld [vmem:[%s3951_s20 + $0xd4] ss:$8 sps:$4 sm:$0xff]  }
 0xa41   : > { %v2348_v28 = vpack.c.bf16 %v2347_v19, %v2346_v25  ;;  %v3744_v25 = vld [vmem:[%s3951_s20 + $0xd0] ss:$8 sps:$4 sm:$0xff]   ;;  %v3745_v19 = vld [vmem:[%s3951_s20 + $0xe4] ss:$8 sps:$4 sm:$0xff]  }
 0xa43   : > { %3399 = vmatmul.mubr.msk.bf16.vlgmr.msra.gmra.mrb[36].mxu1 %vm1934_vm4, %v2348_v28  ;;  %v3746_v28 = vld [vmem:[%s3951_s20 + $0xe0] ss:$8 sps:$4 sm:$0xff]  }
 0xa44   : > { %2403 = vmatpush1.bf16.msra.mxu1 %v4515_v52  ;;  %2434 = vmatprep.mubr.bf16.mxu1 %v5092_v53 }
 0xa45   : > { %2404 = vmatprep.subr.bf16.mxu1 %v4520_v54 }
 0xa48   : > { %2405 = vmatpush1.bf16.msra.mxu1 %v4524_v55 }
 0xa49   : > { %2406 = vmatprep.subr.bf16.mxu1 %v4528_v56 }
 0xa4c   : > { %2407 = vmatpush1.bf16.msra.mxu1 %v4532_v57 }
 0xa4d   : > { %2408 = vmatprep.subr.bf16.mxu1 %v4536_v58 }
 0xa50   : > { %2409 = vmatpush1.bf16.msra.mxu1 %v4540_v59 }
 0xa51   : > { %2410 = vmatprep.subr.bf16.mxu1 %v4544_v60 }
 0xa54   : > { %2411 = vmatpush1.bf16.msra.mxu1 %v4548_v61  ;;  %v5144_v61 = vld [vmem:[#allocation50_spill] sm:$0xff] }
 0xa55   : > { %2412 = vmatprep.subr.bf16.mxu1 %v4552_v62 }
 0xa58   : > { %2413 = vmatpush1.bf16.msra.mxu1 %v4556_v63  ;;  %v5145_v63 = vld [vmem:[#allocation51_spill] sm:$0xff] }
 0xa59   : > { %2414 = vmatprep.subr.bf16.mxu1 %v4560_v1 }
 0xa5c   : > { %2415 = vmatpush1.bf16.msra.mxu1 %v4564_v2 }
 0xa5d   : > { %2416 = vmatprep.subr.bf16.mxu1 %v4568_v3  ;;  %v3703_v3 = vld [vmem:[%s3951_s20] ss:$8 sps:$4 sm:$0xff]  }
 0xa60   : > { %2417 = vmatpush1.bf16.msra.mxu1 %v4572_v4  ;;  %v3704_v4 = vld [vmem:[%s4109_s14] sm:$0xff]  }
 0xa61   : > { %2516 = vmatprep.subr.bf16.mxu1 %v3702_v35  ;;  %v3747_v35 = vld [vmem:[%s3951_s20 + $0xf4] ss:$8 sps:$4 sm:$0xff]  }
 0xb16   : > { %v2386_v37 = vpop.f32.mrb[36].mxu1 }
 0xb17   : > { %v2387_v52 = vadd.f32 %v5143_v39, %v2386_v37  ;;  %v3400_v53 = vpop.f32.mrb[37].mxu1  ;;  %v3748_v37 = vld [vmem:[%s3951_s20 + $0xf0] ss:$8 sps:$4 sm:$0xff]  }
 0xb18   : > { %v2389_v54 = vpop.f32.mrb[38].mxu1 }
 0xb19   : > { %vm2393_vm13 = vcmp.gt.f32.partialorder %v2387_v52, 0.0  ;;  %v2395_v55 = vmul.f32 0.01, %v2387_v52  ;;  %v2390_v56 = vadd.f32 %v5143_v39, %v2389_v54  ;;  %v3401_v57 = vpop.f32.mrb[39].mxu1 }
 0xb1a   : > { %v5147_v57 = vld [vmem:[#allocation7_spill] sm:$0xff] }
 0xb1b   : > { %v2397_v58 = vsel %vm2393_vm13, %v2387_v52, %v2395_v55  ;;  %vm2394_vm14 = vcmp.gt.f32.partialorder %v2390_v56, 0.0  ;;  %v2396_v59 = vmul.f32 0.01, %v2390_v56  ;;  %v3749_v52 = vld [vmem:[%s3951_s20 + $0x104] ss:$8 sps:$4 sm:$0xff]   ;;  %v5146_v55 = vld [vmem:[#allocation4_spill] sm:$0xff] }
 0xb1c   : > { %v2399_v62 = vadd.f32 %v5144_v61, %v2397_v58 }
 0xb1d   : > { %v2398_v60 = vsel %vm2394_vm14, %v2390_v56, %v2396_v59 }
 0xb1e   : > { %v2400_v1 = vadd.f32 %v5145_v63, %v2398_v60 }
 0xb20   : > { %v2401_v2 = vpack.c.bf16 %v2400_v1, %v2399_v62  ;;  %v5148_v62 = vld [vmem:[#allocation5_spill] sm:$0xff] }
 0xb22   : > { %2435 = vmatmul.mubr.bf16.vlgmr.msra.gmra.mrb[40].mxu1 %v2401_v2  ;;  %2478 = vmatmul.mubr.bf16.vlgmr.msra.gmra.mrb[16].mxu0 %v2401_v2  ;;  %v5149_v2 = vld [vmem:[#allocation9_spill] sm:$0xff] }
 0xb23   : > { %2517 = vmatpush1.bf16.msra.mxu1 %v3703_v3  ;;  %3284 = vmatpush3.bf16.msra.mxu0 %v3704_v4 }
 0xb24   : > { %2518 = vmatprep.subr.bf16.mxu1 %v3705_v45  ;;  %3285 = vmatprep.subr.bf16.mxu0 %v3706_v10 }
 0xb27   : > { %2519 = vmatpush1.bf16.msra.mxu1 %v3707_v21  ;;  %3286 = vmatpush3.bf16.msra.mxu0 %v3708_v42 }
 0xb28   : > { %2520 = vmatprep.subr.bf16.mxu1 %v3709_v0  ;;  %3287 = vmatprep.subr.bf16.mxu0 %v3710_v23 }
 0xb2b   : > { %2521 = vmatpush1.bf16.msra.mxu1 %v3711_v13  ;;  %3288 = vmatpush3.bf16.msra.mxu0 %v3712_v27 }
 0xb2c   : > { %2522 = vmatprep.subr.bf16.mxu1 %v3713_v44  ;;  %3289 = vmatprep.subr.bf16.mxu0 %v3714_v41 }
 0xb2f   : > { %2523 = vmatpush1.bf16.msra.mxu1 %v3715_v26  ;;  %3290 = vmatpush3.bf16.msra.mxu0 %v3716_v43 }
 0xb30   : > { %2524 = vmatprep.subr.bf16.mxu1 %v3717_v6  ;;  %3291 = vmatprep.subr.bf16.mxu0 %v3718_v9 }
 0xb33   : > { %2525 = vmatpush1.bf16.msra.mxu1 %v3719_v7  ;;  %3292 = vmatpush3.bf16.msra.mxu0 %v3720_v12 }
 0xb34   : > { %2526 = vmatprep.subr.bf16.mxu1 %v3721_v22  ;;  %3293 = vmatprep.subr.bf16.mxu0 %v3722_v5 }
 0xb37   : > { %2527 = vmatpush1.bf16.msra.mxu1 %v3723_v46  ;;  %3294 = vmatpush3.bf16.msra.mxu0 %v3724_v48 }
 0xb38   : > { %2528 = vmatprep.subr.bf16.mxu1 %v3725_v29  ;;  %3295 = vmatprep.subr.bf16.mxu0 %v3726_v49 }
 0xb3b   : > { %2529 = vmatpush1.bf16.msra.mxu1 %v3727_v51  ;;  %3296 = vmatpush3.bf16.msra.mxu0 %v3728_v15 }
 0xb3c   : > { %2530 = vmatprep.subr.bf16.mxu1 %v3729_v24  ;;  %3297 = vmatprep.subr.bf16.mxu0 %v3730_v16 }
 0xb3f   : > { %2531 = vmatpush1.bf16.msra.mxu1 %v3731_v20  ;;  %3298 = vmatpush3.bf16.msra.mxu0 %v3732_v18  ;;  %v3750_v18 = vld [vmem:[%s3951_s20 + $0x100] ss:$8 sps:$4 sm:$0xff]  }
 0xb40   : > { %2532 = vmatprep.subr.bf16.mxu1 %v3733_v36  ;;  %3402 = vmatprep.subr.bf16.mxu0 %v5083_v31  ;;  %v3751_v36 = vld [vmem:[%s3951_s20 + $0x114] ss:$8 sps:$4 sm:$0xff]  }
 0xb43   : > { %2533 = vmatpush1.bf16.msra.mxu1 %v3734_v17  ;;  %v3752_v17 = vld [vmem:[%s3951_s20 + $0x110] ss:$8 sps:$4 sm:$0xff]  }
 0xb44   : > { %2534 = vmatprep.subr.bf16.mxu1 %v3735_v30  ;;  %v3753_v30 = vld [vmem:[%s3951_s20 + $0x124] ss:$8 sps:$4 sm:$0xff]  }
 0xb47   : > { %2535 = vmatpush1.bf16.msra.mxu1 %v3736_v34  ;;  %v3754_v34 = vld [vmem:[%s3951_s20 + $0x120] ss:$8 sps:$4 sm:$0xff]  }
 0xb48   : > { %2536 = vmatprep.subr.bf16.mxu1 %v3737_v14  ;;  %v3755_v14 = vld [vmem:[%s3951_s20 + $0x134] ss:$8 sps:$4 sm:$0xff]  }
 0xb4b   : > { %2537 = vmatpush1.bf16.msra.mxu1 %v3738_v32  ;;  %v3756_v32 = vld [vmem:[%s3951_s20 + $0x130] ss:$8 sps:$4 sm:$0xff]  }
 0xb4c   : > { %2538 = vmatprep.subr.bf16.mxu1 %v3739_v38  ;;  %v3757_v38 = vld [vmem:[%s3951_s20 + $0x144] ss:$8 sps:$4 sm:$0xff]  }
 0xb4f   : > { %2539 = vmatpush1.bf16.msra.mxu1 %v3740_v8  ;;  %v3758_v8 = vld [vmem:[%s3951_s20 + $0x140] ss:$8 sps:$4 sm:$0xff]  }
 0xb50   : > { %2540 = vmatprep.subr.bf16.mxu1 %v3741_v11  ;;  %v3759_v11 = vld [vmem:[%s3951_s20 + $0x154] ss:$8 sps:$4 sm:$0xff]  }
 0xb53   : > { %2541 = vmatpush1.bf16.msra.mxu1 %v3742_v40  ;;  %v3760_v40 = vld [vmem:[%s3951_s20 + $0x150] ss:$8 sps:$4 sm:$0xff]  }
 0xb54   : > { %2542 = vmatprep.subr.bf16.mxu1 %v3743_v33  ;;  %v3761_v33 = vld [vmem:[%s3951_s20 + $0x164] ss:$8 sps:$4 sm:$0xff]  }
 0xb57   : > { %2543 = vmatpush1.bf16.msra.mxu1 %v3744_v25  ;;  %v3762_v25 = vld [vmem:[%s3951_s20 + $0x160] ss:$8 sps:$4 sm:$0xff]  }
 0xb58   : > { %2544 = vmatprep.subr.bf16.mxu1 %v3745_v19  ;;  %v3763_v19 = vld [vmem:[%s3951_s20 + $0x174] ss:$8 sps:$4 sm:$0xff]  }
 0xb5b   : > { %2545 = vmatpush1.bf16.msra.mxu1 %v3746_v28  ;;  %v3764_v28 = vld [vmem:[%s3951_s20 + $0x170] ss:$8 sps:$4 sm:$0xff]  }
 0xb5c   : > { %2546 = vmatprep.subr.bf16.mxu1 %v3747_v35  ;;  %v3765_v35 = vld [vmem:[%s3951_s20 + $0x184] ss:$8 sps:$4 sm:$0xff]  }
 0xb5f   : > { %2547 = vmatpush1.bf16.msra.mxu1 %v3748_v37  ;;  %v3766_v37 = vld [vmem:[%s3951_s20 + $0x180] ss:$8 sps:$4 sm:$0xff]  }
 0xb60   : > { %2559 = vmatprep.subr.bf16.mxu1 %v3749_v52  ;;  %v3767_v52 = vld [vmem:[%s3951_s20 + $0x194] ss:$8 sps:$4 sm:$0xff]  }
 0xbf5   : > { %v2436_v53 = vpop.f32.mrb[40].mxu1  ;;  %v2479_v54 = vpop.f32.mrb[16].mxu0 }
 0xbf6   : > { %v2437_v56 = vadd.f32 %v2436_v53, %v5146_v55  ;;  %v2480_v58 = vadd.f32 %v2479_v54, %v5147_v57  ;;  %v2438_v59 = vpop.f32.mrb[41].mxu1  ;;  %v2481_v60 = vpop.f32.mrb[17].mxu0  ;;  %v3768_v53 = vld [vmem:[%s3951_s20 + $0x190] ss:$8 sps:$4 sm:$0xff]   ;;  %v3769_v54 = vld [vmem:[%s3951_s20 + $0x1a4] ss:$8 sps:$4 sm:$0xff]  }
 0xbf7   : > { %v2439_v1 = vadd.f32 %v2438_v59, %v5148_v62  ;;  %v2482_v3 = vadd.f32 %v2481_v60, %v5149_v2  ;;  %v2440_v4 = vpop.f32.mrb[42].mxu1  ;;  %v2483_v45 = vpop.f32.mrb[18].mxu0  ;;  %v3774_v59 = vld [vmem:[%s3951_s20 + $0x1c0] ss:$8 sps:$4 sm:$0xff]   ;;  %v3775_v60 = vld [vmem:[%s3951_s20 + $0x1d4] ss:$8 sps:$4 sm:$0xff]  }
 0xbf8   : > { %vm2488_vm15 = vcmp.gt.f32.partialorder %v2437_v56, 0.0  ;;  %v2496_v10 = vmul.f32 0.01, %v2437_v56  ;;  %vm2490_vm0 = vcmp.gt.f32.partialorder %v2480_v58, 0.0  ;;  %v2498_v21 = vmul.f32 0.01, %v2480_v58 }
 0xbf9   : > { %vm2489_vm2 = vcmp.gt.f32.partialorder %v2439_v1, 0.0  ;;  %v2497_v42 = vmul.f32 0.01, %v2439_v1  ;;  %vm2491_vm3 = vcmp.gt.f32.partialorder %v2482_v3, 0.0  ;;  %v2499_v0 = vmul.f32 0.01, %v2482_v3 }
 0xbfa   : > { %v2441_v23 = vadd.f32 %v2440_v4, %v5146_v55  ;;  %v2484_v13 = vadd.f32 %v2483_v45, %v5147_v57  ;;  %v2442_v27 = vpop.f32.mrb[43].mxu1  ;;  %v2485_v44 = vpop.f32.mrb[19].mxu0  ;;  %v2504_v41 = vsel %vm2488_vm15, %v2437_v56, %v2496_v10  ;;  %v4854_v26 = vsel %vm2490_vm0, %v2480_v58, %v2498_v21  ;;  %v3770_v55 = vld [vmem:[%s3951_s20 + $0x1a0] ss:$8 sps:$4 sm:$0xff]   ;;  %v3771_v56 = vld [vmem:[%s3951_s20 + $0x1b4] ss:$8 sps:$4 sm:$0xff]  }
 0xbfb   : > { %v2443_v43 = vadd.f32 %v2442_v27, %v5148_v62  ;;  %v2486_v6 = vadd.f32 %v2485_v44, %v5149_v2  ;;  %v2505_v48 = vsel %vm2489_vm2, %v2439_v1, %v2497_v42  ;;  %v2507_v29 = vsel %vm2491_vm3, %v2482_v3, %v2499_v0  ;;  %v3772_v57 = vld [vmem:[%s3951_s20 + $0x1b0] ss:$8 sps:$4 sm:$0xff]   ;;  %v3773_v58 = vld [vmem:[%s3951_s20 + $0x1c4] ss:$8 sps:$4 sm:$0xff]   ;;  %v3778_v2 = vld [vmem:[%s3951_s20 + $0x1e0] ss:$8 sps:$4 sm:$0xff]  }
 0xbfc   : > { %vm2492_vm5 = vcmp.gt.f32.partialorder %v2441_v23, 0.0  ;;  %v2500_v9 = vmul.f32 0.01, %v2441_v23  ;;  %vm2494_vm6 = vcmp.gt.f32.partialorder %v2484_v13, 0.0  ;;  %v2502_v7 = vmul.f32 0.01, %v2484_v13 }
 0xbfd   : > { %vm2493_vm7 = vcmp.gt.f32.partialorder %v2443_v43, 0.0  ;;  %v2501_v12 = vmul.f32 0.01, %v2443_v43  ;;  %vm2495_vm8 = vcmp.gt.f32.partialorder %v2486_v6, 0.0  ;;  %v2503_v22 = vmul.f32 0.01, %v2486_v6 }
 0xbfe   : > { %v2508_v5 = vsel %vm2492_vm5, %v2441_v23, %v2500_v9  ;;  %v4858_v46 = vsel %vm2494_vm6, %v2484_v13, %v2502_v7  ;;  %v3776_v62 = vld [vmem:[%s3951_s20 + $0x1d0] ss:$8 sps:$4 sm:$0xff]   ;;  %v3777_v1 = vld [vmem:[%s3951_s20 + $0x1e4] ss:$8 sps:$4 sm:$0xff]   ;;  %v3779_v3 = vld [vmem:[%s3951_s20 + $0x1f4] ss:$8 sps:$4 sm:$0xff]  }
 0xbff   : > { %v2512_v49 = vpack.c.bf16 %v2508_v5, %v2504_v41  ;;  %v2514_v51 = vpack.c.bf16 %v4858_v46, %v4854_v26  ;;  %v2509_v15 = vsel %vm2493_vm7, %v2443_v43, %v2501_v12  ;;  %v2511_v24 = vsel %vm2495_vm8, %v2486_v6, %v2503_v22  ;;  %v3780_v4 = vld [vmem:[%s3951_s20 + $0x1f0] ss:$8 sps:$4 sm:$0xff]   ;;  %v3781_v5 = vld [vmem:[%s4337_s30] sm:$0xff]   ;;  %s688_s20 = scalar_lea.vmem %s4970_s13, %s3943_s17 }
 0xc00   : > { %v2513_v16 = vpack.c.bf16 %v2509_v15, %v2505_v48  ;;  %v2515_v20 = vpack.c.bf16 %v2511_v24, %v2507_v29  ;;  %v3783_v46 = vld [vmem:[%s4337_s30 + $0x10] sm:$0xff]   ;;  %v3784_v48 = vld [vmem:[%s4337_s30 + $0x18] sm:$0xff]   ;;  %v3785_v29 = vld [vmem:[%s4337_s30 + $0x20] sm:$0xff]  }
 0xc01   : > { %v3788_v15 = vld [vmem:[%s4337_s30 + $0x38] sm:$0xff]  }
 0xc02   : > { %2548 = vmatprep.mubr.bf16.mxu1 %v2513_v16 }
 0xc03   : > { %2549 = vmatmul.mubr.bf16.vlgmr.msra.gmra.mrb[44].mxu1 %v2512_v49  ;;  %v3786_v49 = vld [vmem:[%s4337_s30 + $0x28] sm:$0xff]  }
 0xc04   : > { %2560 = vmatpush1.bf16.msra.mxu1 %v3750_v18  ;;  %2591 = vmatprep.mubr.bf16.mxu1 %v2515_v20 }
 0xc05   : > { %2561 = vmatprep.subr.bf16.mxu1 %v3751_v36 }
 0xc08   : > { %2562 = vmatpush1.bf16.msra.mxu1 %v3752_v17  ;;  %v3789_v17 = vld [vmem:[%s4420_s21] ss:$0 sm:$0xff] }
 0xc09   : > { %2563 = vmatprep.subr.bf16.mxu1 %v3753_v30 }
 0xc0c   : > { %2564 = vmatpush1.bf16.msra.mxu1 %v3754_v34 }
 0xc0d   : > { %2565 = vmatprep.subr.bf16.mxu1 %v3755_v14 }
 0xc10   : > { %2566 = vmatpush1.bf16.msra.mxu1 %v3756_v32 }
 0xc11   : > { %2567 = vmatprep.subr.bf16.mxu1 %v3757_v38 }
 0xc14   : > { %2568 = vmatpush1.bf16.msra.mxu1 %v3758_v8 }
 0xc15   : > { %2569 = vmatprep.subr.bf16.mxu1 %v3759_v11 }
 0xc18   : > { %2570 = vmatpush1.bf16.msra.mxu1 %v3760_v40 }
 0xc19   : > { %2571 = vmatprep.subr.bf16.mxu1 %v3761_v33  ;;  %v3790_v33 = vld [vmem:[%s4404_s16] sm:$0xff]  }
 0xc1c   : > { %2572 = vmatpush1.bf16.msra.mxu1 %v3762_v25  ;;  %v3791_v25 = vld [vmem:[%s4404_s16 + $0x8] sm:$0xff]  }
 0xc1d   : > { %2573 = vmatprep.subr.bf16.mxu1 %v3763_v19  ;;  %v3792_v19 = vld [vmem:[%s4404_s16 + $0x10] sm:$0xff]  }
 0xc20   : > { %2574 = vmatpush1.bf16.msra.mxu1 %v3764_v28  ;;  %v3793_v28 = vld [vmem:[%s4404_s16 + $0x18] sm:$0xff]  }
 0xc21   : > { %2575 = vmatprep.subr.bf16.mxu1 %v3765_v35 }
 0xc24   : > { %2576 = vmatpush1.bf16.msra.mxu1 %v3766_v37  ;;  %v3794_v37 = vld [vmem:[%s4443_s29] ss:$0 sm:$0xff] }
 0xc25   : > { %2577 = vmatprep.subr.bf16.mxu1 %v3767_v52 }
 0xc28   : > { %2578 = vmatpush1.bf16.msra.mxu1 %v3768_v53 }
 0xc29   : > { %2579 = vmatprep.subr.bf16.mxu1 %v3769_v54 }
 0xc2c   : > { %2580 = vmatpush1.bf16.msra.mxu1 %v3770_v55 }
 0xc2d   : > { %2581 = vmatprep.subr.bf16.mxu1 %v3771_v56 }
 0xc30   : > { %2582 = vmatpush1.bf16.msra.mxu1 %v3772_v57 }
 0xc31   : > { %2583 = vmatprep.subr.bf16.mxu1 %v3773_v58 }
 0xc34   : > { %2584 = vmatpush1.bf16.msra.mxu1 %v3774_v59 }
 0xc35   : > { %2585 = vmatprep.subr.bf16.mxu1 %v3775_v60 }
 0xc38   : > { %2586 = vmatpush1.bf16.msra.mxu1 %v3776_v62 }
 0xc39   : > { %2587 = vmatprep.subr.bf16.mxu1 %v3777_v1  ;;  %v3795_v1 = vld [vmem:[%s4487_s22] sm:$0xff]  }
 0xc3c   : > { %2588 = vmatpush1.bf16.msra.mxu1 %v3778_v2  ;;  %v3796_v2 = vld [vmem:[%s4487_s22 + $0x8] sm:$0xff]  }
 0xc3d   : > { %2589 = vmatprep.subr.bf16.mxu1 %v3779_v3 }
 0xc40   : > { %2590 = vmatpush1.bf16.msra.mxu1 %v3780_v4  ;;  %v3797_v4 = vld [vmem:[%s4506_s19] ss:$0 sm:$0xff] }
 0xc43   : > { %2592 = vmatmul.mubr.bf16.vlgmr.msra.gmra.mrb[44].mxu1 %v2514_v51  ;;  %v3787_v51 = vld [vmem:[%s4337_s30 + $0x30] sm:$0xff]  }
 0xd16   : > { %v2593_v45 = vpop.f32.mrb[44].mxu1 }
 0xd17   : > { %v3450_v10 = vadd.f32 %v2593_v45, %v5133_v47  ;;  %v2595_v21 = vpop.f32.mrb[45].mxu1 }
 0xd18   : > { %v3451_v42 = vadd.f32 %v2595_v21, %v5134_v50  ;;  %v2597_v0 = vpop.f32.mrb[46].mxu1 }
 0xd19   : > { %v2606_v23 = vmul.f32 0.01, %v3450_v10  ;;  %v3452_v13 = vadd.f32 %v2597_v0, %v5133_v47  ;;  %v2599_v27 = vpop.f32.mrb[47].mxu1  ;;  %vm2602_vm9 = vcmp.gt.f32.partialorder %v3450_v10, 0.0 }
 0xd1a   : > { %v2607_v44 = vmul.f32 0.01, %v3451_v42  ;;  %v3453_v41 = vadd.f32 %v2599_v27, %v5134_v50  ;;  %vm2603_vm10 = vcmp.gt.f32.partialorder %v3451_v42, 0.0  ;;  %v3782_v50 = vld [vmem:[%s4337_s30 + $0x8] sm:$0xff]  }
 0xd1b   : > { %vm2604_vm11 = vcmp.gt.f32.partialorder %v3452_v13, 0.0  ;;  %v2608_v26 = vmul.f32 0.01, %v3452_v13  ;;  %v2610_v6 = vsel %vm2602_vm9, %v3450_v10, %v2606_v23 }
 0xd1c   : > { %vm2605_vm13 = vcmp.gt.f32.partialorder %v3453_v41, 0.0  ;;  %v2609_v43 = vmul.f32 0.01, %v3453_v41  ;;  %v2611_v12 = vsel %vm2603_vm10, %v3451_v42, %v2607_v44 }
 0xd1d   : > { %v2612_v9 = vsel %vm2604_vm11, %v3452_v13, %v2608_v26 }
 0xd1e   : > { %v2614_v7 = vpack.c.bf16 %v2612_v9, %v2610_v6  ;;  %v2613_v22 = vsel %vm2605_vm13, %v3453_v41, %v2609_v43 }
 0xd1f   : > { %v2615_v47 = vpack.c.bf16 %v2613_v22, %v2611_v12 }
 0xd21   : > { %2648 = vmatprep.mubr.bf16.mxu0 %v2615_v47 }
 0xd22   : > { %2649 = vmatmul.mubr.bf16.vlgmr.msra.gmra.mrb[20].mxu0 %v2614_v7  ;;  %v3798_v7 = vld [vmem:[%s4583_s0] ss:$0 sm:$0xff] }
 0xd23   : > { %3403 = vmatpush3.bf16.msra.mxu0 %v3781_v5  ;;  %3418 = vmatprep.mubr.msk.bf16.mxu0 %vm3825_vm12, %v5083_v31 }
 0xd24   : > { %3404 = vmatprep.subr.bf16.mxu0 %v5083_v31 }
 0xd27   : > { %3405 = vmatpush3.bf16.msra.mxu0 %v3782_v50 }
 0xd28   : > { %3406 = vmatprep.subr.bf16.mxu0 %v5083_v31 }
 0xd2b   : > { %3407 = vmatpush3.bf16.msra.mxu0 %v3783_v46 }
 0xd2c   : > { %3408 = vmatprep.subr.bf16.mxu0 %v5083_v31 }
 0xd2f   : > { %3409 = vmatpush3.bf16.msra.mxu0 %v3784_v48 }
 0xd30   : > { %3410 = vmatprep.subr.bf16.mxu0 %v5083_v31 }
 0xd33   : > { %3411 = vmatpush3.bf16.msra.mxu0 %v3785_v29 }
 0xd34   : > { %3412 = vmatprep.subr.bf16.mxu0 %v5083_v31 }
 0xd37   : > { %3413 = vmatpush3.bf16.msra.mxu0 %v3786_v49 }
 0xd38   : > { %3414 = vmatprep.subr.bf16.mxu0 %v5083_v31 }
 0xd3b   : > { %3415 = vmatpush3.bf16.msra.mxu0 %v3787_v51 }
 0xd3c   : > { %3416 = vmatprep.subr.bf16.mxu0 %v5083_v31 }
 0xd3f   : > { %3417 = vmatpush3.bf16.msra.mxu0 %v3788_v15 }
 0xd40   : > { %3422 = vmatprep.subr.bf16.mxu0 %v5083_v31 }
 0xdf5   : > { %v3299_v24 = vpop.f32.mrb[20].mxu0 }
 0xdf6   : > { %v3300_v16 = vpop.f32.mrb[21].mxu0 }
 0xdf7   : > { %v3301_v20 = vadd.f32 %v3300_v16, %v3299_v24  ;;  %v3302_v18 = vpop.f32.mrb[22].mxu0 }
 0xdf8   : > { %v3303_v36 = vpop.f32.mrb[23].mxu0 }
 0xdf9   : > { %v2651_v30 = vadd.f32 %v3789_v17, %v3301_v20  ;;  %v3304_v34 = vadd.f32 %v3303_v36, %v3302_v18 }
 0xdfb   : > { %v2659_v14 = vmul.f32 0.01, %v2651_v30  ;;  %v2654_v32 = vadd.f32 %v3789_v17, %v3304_v34  ;;  %vm2657_vm14 = vcmp.gt.f32.partialorder %v2651_v30, 0.0 }
 0xdfd   : > { %vm2658_vm15 = vcmp.gt.f32.partialorder %v2654_v32, 0.0  ;;  %v2660_v38 = vmul.f32 0.01, %v2654_v32  ;;  %v2661_v8 = vsel %vm2657_vm14, %v2651_v30, %v2659_v14 }
 0xdff   : > { %v2662_v11 = vsel %vm2658_vm15, %v2654_v32, %v2660_v38 }
 0xe00   : > { %v2663_v40 = vpack.c.bf16 %v2662_v11, %v2661_v8 }
 0xe02   : > { %3419 = vmatmul.mubr.bf16.vlgmr.msra.gmra.mrb[24].mxu0 %v2663_v40 }
 0xe03   : > { %3423 = vmatpush3.bf16.msra.mxu0 %v3790_v33  ;;  %3430 = vmatprep.mubr.msk.bf16.mxu0 %vm3825_vm12, %v5083_v31 }
 0xe04   : > { %3424 = vmatprep.subr.bf16.mxu0 %v5083_v31 }
 0xe07   : > { %3425 = vmatpush3.bf16.msra.mxu0 %v3791_v25 }
 0xe08   : > { %3426 = vmatprep.subr.bf16.mxu0 %v5083_v31 }
 0xe0b   : > { %3427 = vmatpush3.bf16.msra.mxu0 %v3792_v19 }
 0xe0c   : > { %3428 = vmatprep.subr.bf16.mxu0 %v5083_v31 }
 0xe0f   : > { %3429 = vmatpush3.bf16.msra.mxu0 %v3793_v28 }
 0xe10   : > { %3434 = vmatprep.subr.bf16.mxu0 %v5083_v31 }
 0xed5   : > { %v2698_v35 = vpop.f32.mrb[24].mxu0 }
 0xed6   : > { %v2699_v52 = vadd.f32 %v3794_v37, %v2698_v35  ;;  %v3420_v53 = vpop.f32.mrb[25].mxu0 }
 0xed7   : > { %v2701_v54 = vpop.f32.mrb[26].mxu0 }
 0xed8   : > { %v2707_v55 = vmul.f32 0.01, %v2699_v52  ;;  %v2702_v56 = vadd.f32 %v3794_v37, %v2701_v54  ;;  %v3421_v57 = vpop.f32.mrb[27].mxu0  ;;  %vm2705_vm0 = vcmp.gt.f32.partialorder %v2699_v52, 0.0 }
 0xeda   : > { %vm2706_vm2 = vcmp.gt.f32.partialorder %v2702_v56, 0.0  ;;  %v2708_v58 = vmul.f32 0.01, %v2702_v56  ;;  %v2709_v59 = vsel %vm2705_vm0, %v2699_v52, %v2707_v55 }
 0xedc   : > { %v2710_v60 = vsel %vm2706_vm2, %v2702_v56, %v2708_v58 }
 0xedd   : > { %v2711_v62 = vpack.c.bf16 %v2710_v60, %v2709_v59 }
 0xedf   : > { %3431 = vmatmul.mubr.msk.bf16.vlgmr.msra.gmra.mrb[28].mxu0 %vm1864_vm1, %v2711_v62 }
 0xee0   : > { %3435 = vmatpush3.bf16.msra.mxu0 %v3795_v1  ;;  %3438 = vmatprep.mubr.msk.bf16.mxu0 %vm3825_vm12, %v5083_v31 }
 0xee1   : > { %3436 = vmatprep.subr.bf16.mxu0 %v5083_v31 }
 0xee4   : > { %3437 = vmatpush3.bf16.msra.mxu0 %v3796_v2 }
 0xfb2   : > { %v2749_v3 = vpop.f32.mrb[28].mxu0 }
 0xfb3   : > { %v2750_v45 = vadd.f32 %v3797_v4, %v2749_v3  ;;  %v3432_v10 = vpop.f32.mrb[29].mxu0 }
 0xfb4   : > { %v2752_v21 = vpop.f32.mrb[30].mxu0 }
 0xfb5   : > { %v2758_v42 = vmul.f32 0.01, %v2750_v45  ;;  %v2753_v0 = vadd.f32 %v3797_v4, %v2752_v21  ;;  %v3433_v23 = vpop.f32.mrb[31].mxu0  ;;  %vm2756_vm3 = vcmp.gt.f32.partialorder %v2750_v45, 0.0 }
 0xfb7   : > { %vm2757_vm1 = vcmp.gt.f32.partialorder %v2753_v0, 0.0  ;;  %v2759_v13 = vmul.f32 0.01, %v2753_v0  ;;  %v2760_v27 = vsel %vm2756_vm3, %v2750_v45, %v2758_v42 }
 0xfb9   : > { %v2761_v44 = vsel %vm2757_vm1, %v2753_v0, %v2759_v13 }
 0xfba   : > { %v2762_v41 = vpack.c.bf16 %v2761_v44, %v2760_v27 }
 0xfbc   : > { %3439 = vmatmul.mubr.msk.bf16.vlgmr.msra.gmra.mrb[32].mxu0 %vm1934_vm4, %v2762_v41 }
0x108f   : > { %v2800_v31 = vpop.f32.mrb[32].mxu0 }
0x1090   : > { %v2801_v26 = vadd.f32 %v5143_v39, %v2800_v31  ;;  %v3440_v43 = vpop.f32.mrb[33].mxu0 }
0x1091   : > { %v2803_v6 = vpop.f32.mrb[34].mxu0 }
0x1092   : > { %vm2807_vm12 = vcmp.gt.f32.partialorder %v2801_v26, 0.0  ;;  %v2809_v9 = vmul.f32 0.01, %v2801_v26  ;;  %v2804_v12 = vadd.f32 %v3798_v7, %v2803_v6  ;;  %v3441_v22 = vpop.f32.mrb[35].mxu0 }
0x1094   : > { %v2811_v47 = vsel %vm2807_vm12, %v2801_v26, %v2809_v9  ;;  %vm2808_vm5 = vcmp.gt.f32.partialorder %v2804_v12, 0.0  ;;  %v2810_v5 = vmul.f32 0.01, %v2804_v12 }
0x1095   : > { %v2813_v50 = vadd.f32 %v5144_v61, %v2811_v47 }
0x1096   : > { %v2812_v46 = vsel %vm2808_vm5, %v2804_v12, %v2810_v5 }
0x1097   : > { %2815 = vst [vmem:[%s688_s20] sm:$0xff] %v2813_v50  ;;  %v2814_v39 = vadd.f32 %v5145_v63, %v2812_v46 }
0x1099   : > { %2816 = vst [vmem:[%s688_s20 + $0x8] sm:$0xff] %v2814_v39 }
0x109a PF: > { %s23_s27 = sadd.s32 1, %s3821_s27   ;;  %s5150_s25 = smov %s3817_s26 }
0x109b   : > { %p20_p5 = scmp.ge.s32.totalorder %s23_s27, 6   ;;  %s5151_s26 = smov %s5153_s28 }
0x109d   :  { %22 = sbr.rel (!%p20_p5) target bundleno = 2 (0x2), region = 138 }

</bundles_post_ra>
